<compile_context>
chip_gen: v5e
topology: v5e:2x2
jax: 0.10.0
libtpu: 0.0.40
codegen_flags: <defaults>
</compile_context>

<pallas_src>
import math

import jax
import jax.numpy as jnp
import numpy as np
from jax.experimental import pallas as pl
from jax.experimental.pallas import tpu as pltpu

TASKS = ("to", "as", "about")


# ----------------------------------------------------------------------------
# Fused bidirectional LSTM kernel (embeddings folded into the input projection).
# Grid axis 0 = direction (0 = forward, 1 = backward), marked "parallel".
# ----------------------------------------------------------------------------
def _make_bilstm_kernel(num_vocabs, T, B, E, H):
    G = 4 * H          # fused gate width (i, f, g, o)
    N = T * B          # tokens, time-major

    def kernel(*refs):
        idx_refs = refs[:num_vocabs]                     # each (N, 1) int32, time-major
        emb_refs = refs[num_vocabs:2 * num_vocabs]       # each (V_i, E) f32
        wih_ref, whh_ref, b_ref = refs[2 * num_vocabs:2 * num_vocabs + 3]
        y_ref, hn_ref, cn_ref = refs[2 * num_vocabs + 3:2 * num_vocabs + 6]
        xpre_ref = refs[2 * num_vocabs + 6]              # (T, B, 4H) scratch

        d = pl.program_id(0)                             # direction

        # ---- hoisted input projection: X @ W_ih + b for ALL timesteps --------
        # xpre[t, b] = sum_i (emb_i @ W_ih_i)[idx_i[t, b]] + (b_ih + b_hh)
        acc = jnp.broadcast_to(b_ref[...], (N, G))       # (N, 4H) bias, hoisted
        for i in range(num_vocabs):
            emb = emb_refs[i][...]                       # (V_i, E)
            V = emb.shape[0]
            proj = jnp.dot(emb, wih_ref[i * E:(i + 1) * E, :],
                           preferred_element_type=jnp.float32)      # (V_i, 4H)
            iota = jax.lax.broadcasted_iota(jnp.int32, (N, V), 1)
            onehot = (idx_refs[i][...] == iota).astype(jnp.float32)  # (N, V_i)
            acc = acc + jnp.dot(onehot, proj,
                                preferred_element_type=jnp.float32)  # (N, 4H)
        # Scatter into time-major (T, B, 4H) scratch with static slices so the
        # recurrence only does a cheap dynamic first-axis load per step.
        for t in range(T):
            xpre_ref[t] = acc[t * B:(t + 1) * B, :]

        # ---- recurrence: ONE (B,H)@(H,4H) MXU push per step -------------------
        def step(s, carry):
            h, c = carry
            t = jnp.where(d == 0, s, T - 1 - s)          # reverse time for dir 1
            gates = xpre_ref[t] + jnp.dot(h, whh_ref[...],
                                          preferred_element_type=jnp.float32)  # (B,4H)
            i_g = jax.nn.sigmoid(gates[:, 0 * H:1 * H])
            f_g = jax.nn.sigmoid(gates[:, 1 * H:2 * H])
            g_g = jnp.tanh(gates[:, 2 * H:3 * H])
            o_g = jax.nn.sigmoid(gates[:, 3 * H:4 * H])
            c_new = f_g * c + i_g * g_g
            h_new = o_g * jnp.tanh(c_new)
            y_ref[t] = h_new                             # stored at true time index
            return h_new, c_new

        h0 = jnp.zeros((B, H), jnp.float32)
        c0 = jnp.zeros((B, H), jnp.float32)
        h_fin, c_fin = jax.lax.fori_loop(0, T, step, (h0, c0), unroll=True)
        hn_ref[...] = h_fin
        cn_ref[...] = c_fin

    return kernel


def lstm_enc_forward(dep_tags, params):
    """dep_tags[i]: (B, T) int32 -> (out (B,T,2H), (h_n, c_n) each (2,B,H))."""
    num_vocabs = len(dep_tags)
    B, T = dep_tags[0].shape
    emb = params["emb"]
    E = emb[0].shape[1]
    w_ih, w_hh, b = params["w_ih"], params["w_hh"], params["b"]
    H = w_hh.shape[1]
    G = 4 * H
    D = E * num_vocabs

    # Time-major flattened indices: row n = (t, b) with t major.  Tiny int transpose.
    idx_tb = [jnp.transpose(dep_tags[i]).reshape(T * B, 1).astype(jnp.int32)
              for i in range(num_vocabs)]

    kernel = _make_bilstm_kernel(num_vocabs, T, B, E, H)

    in_specs = (
        [pl.BlockSpec((T * B, 1), lambda d: (0, 0))] * num_vocabs
        + [pl.BlockSpec(emb[i].shape, lambda d: (0, 0)) for i in range(num_vocabs)]
        + [pl.BlockSpec((None, D, G), lambda d: (d, 0, 0)),   # per-direction W_ih
           pl.BlockSpec((None, H, G), lambda d: (d, 0, 0)),   # per-direction W_hh
           pl.BlockSpec((None, 1, G), lambda d: (d, 0, 0))]   # per-direction bias
    )
    out_specs = (
        pl.BlockSpec((None, T, B, H), lambda d: (d, 0, 0, 0)),
        pl.BlockSpec((None, B, H), lambda d: (d, 0, 0)),
        pl.BlockSpec((None, B, H), lambda d: (d, 0, 0)),
    )
    out_shape = (
        jax.ShapeDtypeStruct((2, T, B, H), jnp.float32),
        jax.ShapeDtypeStruct((2, B, H), jnp.float32),
        jax.ShapeDtypeStruct((2, B, H), jnp.float32),
    )

    y, h_n, c_n = pl.pallas_call(
        kernel,
        grid=(2,),                                  # directions; independent chains
        in_specs=in_specs,
        out_specs=out_specs,
        out_shape=out_shape,
        scratch_shapes=[pltpu.VMEM((T, B, G), jnp.float32)],
        compiler_params=pltpu.CompilerParams(
            dimension_semantics=("parallel",)),     # 2 TCs on v7x; no-op on v5e/v6e
    )(*idx_tb, *emb, w_ih, w_hh, b)

    # Assemble PyTorch batch-first output (B, T, 2H); backward states were already
    # written at their true time index, so no reversal is needed here.
    out = jnp.concatenate([y[0], y[1]], axis=-1)    # (T, B, 2H)
    out = jnp.transpose(out, (1, 0, 2))             # (B, T, 2H)
    return out, (h_n, c_n)


# ----------------------------------------------------------------------------
# Task head: Dropout(eval = identity) + Linear, as a small Pallas kernel.
# ----------------------------------------------------------------------------
def _head_kernel(x_ref, w_ref, b_ref, o_ref):
    o_ref[...] = (jnp.dot(x_ref[...], w_ref[...],
                          preferred_element_type=jnp.float32) + b_ref[...])


def task_head(x, w, b):
    B, _ = x.shape
    L = w.shape[1]
    return pl.pallas_call(
        _head_kernel,
        out_shape=jax.ShapeDtypeStruct((B, L), jnp.float32),
        in_specs=[pl.BlockSpec(memory_space=pltpu.MemorySpace.VMEM)] * 3,
        out_specs=pl.BlockSpec(memory_space=pltpu.MemorySpace.VMEM),
    )(x, w, b)


# ----------------------------------------------------------------------------
# Full MultiWithDependencies forward (minus the pretrained transformer encoder).
# ----------------------------------------------------------------------------
def multi_with_dependencies_forward(cls_out, dep_tags, params):
    # TODO(synk): AutoModel.from_pretrained transformer encoder not translated;
    # `cls_out` stands in for encoder(input_ids, ...)[0][:, 0].
    lstm_out, (h_n, c_n) = lstm_enc_forward(dep_tags, params["lstm"])
    lstm_cat = jnp.concatenate([h_n[0], h_n[1]], axis=1)      # (B, 2H)
    feat = jnp.concatenate([cls_out, lstm_cat], axis=1)       # (B, enc_dim + 2H)
    # nn.Dropout(p=0.1) is the identity in eval mode.
    logits = task_head(feat, params["head_w"], params["head_b"])
    tasks_output = {t: logits for t in TASKS}
    return tasks_output, (lstm_out, (h_n, c_n))


# ----------------------------------------------------------------------------
# Parameter init (deterministic; mirrors the PyTorch module's shapes).
# Gate order along the fused 4H axis is i, f, g, o (PyTorch order).
# ----------------------------------------------------------------------------
def init_params(key, embedding_dim, hidden_dim, vocab_sizes, encoder_dim, num_labels):
    num_vocabs = len(vocab_sizes)
    D = embedding_dim * num_vocabs
    H = hidden_dim
    G = 4 * H
    keys = jax.random.split(key, num_vocabs + 6)

    # nn.Embedding default init: N(0, 1)
    emb = [jax.random.normal(keys[i], (vocab_sizes[i], embedding_dim), jnp.float32)
           for i in range(num_vocabs)]

    def uni(kk, shape, bnd):
        return jax.random.uniform(kk, shape, jnp.float32, -bnd, bnd)

    # nn.LSTM default init: U(-1/sqrt(H), 1/sqrt(H)); fused per-direction layout.
    bound = 1.0 / math.sqrt(H)
    k = num_vocabs
    w_ih = uni(keys[k], (2, D, G), bound); k += 1
    w_hh = uni(keys[k], (2, H, G), bound); k += 1
    b_ih = uni(keys[k], (2, 1, G), bound); k += 1
    b_hh = uni(keys[k], (2, 1, G), bound); k += 1

    # nn.Linear(encoder_dim + 2H -> num_labels): U(-1/sqrt(F), 1/sqrt(F)).
    F = encoder_dim + 2 * H
    hb = 1.0 / math.sqrt(F)
    head_w = uni(keys[k], (F, num_labels), hb); k += 1
    head_b = uni(keys[k], (1, num_labels), hb); k += 1

    return {"lstm": {"emb": emb, "w_ih": w_ih, "w_hh": w_hh, "b": b_ih + b_hh},
            "head_w": head_w, "head_b": head_b}


# ----------------------------------------------------------------------------
# Pure-JAX reference (numerical sanity check only).
# ----------------------------------------------------------------------------
def _ref_lstm(dep_tags, params):
    hp = jax.lax.Precision.HIGHEST
    emb = params["emb"]
    x = jnp.concatenate([jnp.take(emb[i], dep_tags[i], axis=0)
                         for i in range(len(dep_tags))], axis=2)   # (B, T, D)
    xt = jnp.transpose(x, (1, 0, 2))                               # (T, B, D)
    H = params["w_hh"].shape[1]
    B = xt.shape[1]

    def run(xs, w_ih, w_hh, b):
        def step(carry, x_t):
            h, c = carry
            g = (jnp.dot(x_t, w_ih, precision=hp)
                 + jnp.dot(h, w_hh, precision=hp) + b)
            i = jax.nn.sigmoid(g[:, :H])
            f = jax.nn.sigmoid(g[:, H:2 * H])
            gg = jnp.tanh(g[:, 2 * H:3 * H])
            o = jax.nn.sigmoid(g[:, 3 * H:])
            c = f * c + i * gg
            h = o * jnp.tanh(c)
            return (h, c), h

        init = (jnp.zeros((B, H), jnp.float32), jnp.zeros((B, H), jnp.float32))
        (h, c), ys = jax.lax.scan(step, init, xs)
        return ys, h, c

    y_f, h_f, c_f = run(xt, params["w_ih"][0], params["w_hh"][0], params["b"][0])
    y_b_rev, h_b, c_b = run(xt[::-1], params["w_ih"][1], params["w_hh"][1], params["b"][1])
    y_b = y_b_rev[::-1]
    out = jnp.transpose(jnp.concatenate([y_f, y_b], -1), (1, 0, 2))
    return out, (jnp.stack([h_f, h_b]), jnp.stack([c_f, c_b]))


if __name__ == "__main__":
    B, T = 2, 8
    embedding_dim, hidden_dim = 16, 32
    vocab_sizes = [11, 7]            # synthetic vocab.get_vocab_sizes()
    encoder_dim, num_labels = 64, 2

    key = jax.random.PRNGKey(0)
    kp, k1, k2, k3 = jax.random.split(key, 4)
    params = init_params(kp, embedding_dim, hidden_dim, vocab_sizes,
                         encoder_dim, num_labels)

    dep_tags = [
        jax.random.randint(k1, (B, T), 0, vocab_sizes[0], dtype=jnp.int32),
        jax.random.randint(k2, (B, T), 0, vocab_sizes[1], dtype=jnp.int32),
    ]
    cls_out = jax.random.normal(k3, (B, encoder_dim), jnp.float32)

    tasks_out, (lstm_out, (h_n, c_n)) = multi_with_dependencies_forward(
        cls_out, dep_tags, params)
    jax.block_until_ready((tasks_out, lstm_out, h_n, c_n))

    assert lstm_out.shape == (B, T, 2 * hidden_dim)
    assert h_n.shape == (2, B, hidden_dim)
    assert c_n.shape == (2, B, hidden_dim)
    for t in TASKS:
        assert tasks_out[t].shape == (B, num_labels)

    # Numerical check against a pure-JAX reference.
    ref_out, (ref_h, ref_c) = _ref_lstm(dep_tags, params["lstm"])
    np.testing.assert_allclose(np.asarray(lstm_out), np.asarray(ref_out),
                               rtol=2e-3, atol=2e-3)
    np.testing.assert_allclose(np.asarray(h_n), np.asarray(ref_h), rtol=2e-3, atol=2e-3)
    np.testing.assert_allclose(np.asarray(c_n), np.asarray(ref_c), rtol=2e-3, atol=2e-3)

    ref_feat = jnp.concatenate(
        [cls_out, jnp.concatenate([ref_h[0], ref_h[1]], axis=1)], axis=1)
    ref_logits = ref_feat @ params["head_w"] + params["head_b"]
    np.testing.assert_allclose(np.asarray(tasks_out["to"]), np.asarray(ref_logits),
                               rtol=2e-3, atol=2e-3)

    print("KERNEL_OK")
</pallas_src>

<mosaic_0001>
module attributes {stable_mosaic.version = 11 : i64} {
  func.func @kernel(%arg0: i32, %arg1: memref<16x1xi32, #tpu.memory_space<vmem>>, %arg2: memref<16x1xi32, #tpu.memory_space<vmem>>, %arg3: memref<11x16xf32, #tpu.memory_space<vmem>>, %arg4: memref<7x16xf32, #tpu.memory_space<vmem>>, %arg5: memref<1x32x128xf32, #tpu.memory_space<vmem>>, %arg6: memref<1x32x128xf32, #tpu.memory_space<vmem>>, %arg7: memref<1x1x128xf32, #tpu.memory_space<vmem>>, %arg8: memref<1x8x2x32xf32, #tpu.memory_space<vmem>>, %arg9: memref<1x2x32xf32, #tpu.memory_space<vmem>>, %arg10: memref<1x2x32xf32, #tpu.memory_space<vmem>>, %arg11: memref<8x2x128xf32, #tpu.memory_space<vmem>>) attributes {dimension_semantics = [#tpu.dimension_semantics<parallel>], iteration_bounds = array<i64: 2>, scalar_prefetch = 0 : i64, scratch_operands = 1 : i64, tpu.core_type = #tpu.core_type<tc>, window_params = [{pipeline_mode = #tpu.pipeline_mode<synchronous>, transform_indices = @transform_0, window_bounds = array<i64: 16, 1>}, {pipeline_mode = #tpu.pipeline_mode<synchronous>, transform_indices = @transform_1, window_bounds = array<i64: 16, 1>}, {pipeline_mode = #tpu.pipeline_mode<synchronous>, transform_indices = @transform_2, window_bounds = array<i64: 11, 16>}, {pipeline_mode = #tpu.pipeline_mode<synchronous>, transform_indices = @transform_3, window_bounds = array<i64: 7, 16>}, {transform_indices = @transform_4, window_bounds = array<i64: 1, 32, 128>}, {transform_indices = @transform_5, window_bounds = array<i64: 1, 32, 128>}, {transform_indices = @transform_6, window_bounds = array<i64: 1, 1, 128>}, {transform_indices = @transform_7, window_bounds = array<i64: 1, 8, 2, 32>}, {transform_indices = @transform_8, window_bounds = array<i64: 1, 2, 32>}, {transform_indices = @transform_9, window_bounds = array<i64: 1, 2, 32>}]} {
    %c0 = arith.constant 0 : index
    %c0_0 = arith.constant 0 : index
    %c0_1 = arith.constant 0 : index
    %0 = vector.load %arg7[%c0, %c0_0, %c0_1] : memref<1x1x128xf32, #tpu.memory_space<vmem>>, vector<1x1x128xf32>
    %1 = vector.shape_cast %0 : vector<1x1x128xf32> to vector<1x128xf32>
    %2 = vector.shape_cast %1 : vector<1x128xf32> to vector<1x128xf32>
    %3 = vector.broadcast %2 : vector<1x128xf32> to vector<16x128xf32>
    %c0_2 = arith.constant 0 : index
    %c0_3 = arith.constant 0 : index
    %4 = vector.load %arg3[%c0_2, %c0_3] : memref<11x16xf32, #tpu.memory_space<vmem>>, vector<11x16xf32>
    %c0_4 = arith.constant 0 : index
    %c0_5 = arith.constant 0 : index
    %c0_6 = arith.constant 0 : index
    %5 = vector.load %arg5[%c0_4, %c0_5, %c0_6] : memref<1x32x128xf32, #tpu.memory_space<vmem>>, vector<1x16x128xf32>
    %6 = vector.shape_cast %5 : vector<1x16x128xf32> to vector<16x128xf32>
    %cst = arith.constant dense<0.000000e+00> : vector<11x128xf32>
    %7 = tpu.matmul %4, %6, %cst {dimension_numbers = #tpu.dot_dimension_numbers<[1], [0], [0], [1], [0, 0, 1, 1], [], []>} : vector<11x16xf32>, vector<16x128xf32>, vector<11x128xf32> -> vector<11x128xf32>
    %8 = tpu.iota {dimensions = array<i32: 1>} : vector<16x11xi32>
    %c0_7 = arith.constant 0 : index
    %c0_8 = arith.constant 0 : index
    %9 = vector.load %arg1[%c0_7, %c0_8] : memref<16x1xi32, #tpu.memory_space<vmem>>, vector<16x1xi32>
    %10 = vector.broadcast %9 : vector<16x1xi32> to vector<16x11xi32>
    %11 = arith.cmpi eq, %10, %8 : vector<16x11xi32>
    %12 = arith.extui %11 : vector<16x11xi1> to vector<16x11xi32>
    %13 = arith.sitofp %12 : vector<16x11xi32> to vector<16x11xf32>
    %cst_9 = arith.constant dense<0.000000e+00> : vector<16x128xf32>
    %14 = tpu.matmul %13, %7, %cst_9 {dimension_numbers = #tpu.dot_dimension_numbers<[1], [0], [0], [1], [0, 0, 1, 1], [], []>} : vector<16x11xf32>, vector<11x128xf32>, vector<16x128xf32> -> vector<16x128xf32>
    %15 = arith.addf %3, %14 : vector<16x128xf32>
    %c0_10 = arith.constant 0 : index
    %c0_11 = arith.constant 0 : index
    %16 = vector.load %arg4[%c0_10, %c0_11] : memref<7x16xf32, #tpu.memory_space<vmem>>, vector<7x16xf32>
    %c0_12 = arith.constant 0 : index
    %c16 = arith.constant 16 : index
    %c0_13 = arith.constant 0 : index
    %17 = vector.load %arg5[%c0_12, %c16, %c0_13] : memref<1x32x128xf32, #tpu.memory_space<vmem>>, vector<1x16x128xf32>
    %18 = vector.shape_cast %17 : vector<1x16x128xf32> to vector<16x128xf32>
    %cst_14 = arith.constant dense<0.000000e+00> : vector<7x128xf32>
    %19 = tpu.matmul %16, %18, %cst_14 {dimension_numbers = #tpu.dot_dimension_numbers<[1], [0], [0], [1], [0, 0, 1, 1], [], []>} : vector<7x16xf32>, vector<16x128xf32>, vector<7x128xf32> -> vector<7x128xf32>
    %20 = tpu.iota {dimensions = array<i32: 1>} : vector<16x7xi32>
    %c0_15 = arith.constant 0 : index
    %c0_16 = arith.constant 0 : index
    %21 = vector.load %arg2[%c0_15, %c0_16] : memref<16x1xi32, #tpu.memory_space<vmem>>, vector<16x1xi32>
    %22 = vector.broadcast %21 : vector<16x1xi32> to vector<16x7xi32>
    %23 = arith.cmpi eq, %22, %20 : vector<16x7xi32>
    %24 = arith.extui %23 : vector<16x7xi1> to vector<16x7xi32>
    %25 = arith.sitofp %24 : vector<16x7xi32> to vector<16x7xf32>
    %cst_17 = arith.constant dense<0.000000e+00> : vector<16x128xf32>
    %26 = tpu.matmul %25, %19, %cst_17 {dimension_numbers = #tpu.dot_dimension_numbers<[1], [0], [0], [1], [0, 0, 1, 1], [], []>} : vector<16x7xf32>, vector<7x128xf32>, vector<16x128xf32> -> vector<16x128xf32>
    %27 = arith.addf %15, %26 : vector<16x128xf32>
    %28 = vector.extract_strided_slice %27 {offsets = [0, 0], sizes = [2, 128], strides = [1, 1]} : vector<16x128xf32> to vector<2x128xf32>
    %c0_18 = arith.constant 0 : index
    %c0_19 = arith.constant 0 : index
    %c0_20 = arith.constant 0 : index
    %29 = vector.load %arg11[%c0_18, %c0_19, %c0_20] : memref<8x2x128xf32, #tpu.memory_space<vmem>>, vector<1x2x128xf32>
    %30 = vector.shape_cast %29 : vector<1x2x128xf32> to vector<2x128xf32>
    %31 = vector.shape_cast %28 : vector<2x128xf32> to vector<1x2x128xf32>
    tpu.vector_store %arg11[%c0_18, %c0_19, %c0_20], %31 {strides = array<i32>} : memref<8x2x128xf32, #tpu.memory_space<vmem>>, vector<1x2x128xf32>,
    %32 = vector.extract_strided_slice %27 {offsets = [2, 0], sizes = [2, 128], strides = [1, 1]} : vector<16x128xf32> to vector<2x128xf32>
    %c1 = arith.constant 1 : index
    %c0_21 = arith.constant 0 : index
    %c0_22 = arith.constant 0 : index
    %33 = vector.load %arg11[%c1, %c0_21, %c0_22] : memref<8x2x128xf32, #tpu.memory_space<vmem>>, vector<1x2x128xf32>
    %34 = vector.shape_cast %33 : vector<1x2x128xf32> to vector<2x128xf32>
    %35 = vector.shape_cast %32 : vector<2x128xf32> to vector<1x2x128xf32>
    tpu.vector_store %arg11[%c1, %c0_21, %c0_22], %35 {strides = array<i32>} : memref<8x2x128xf32, #tpu.memory_space<vmem>>, vector<1x2x128xf32>,
    %36 = vector.extract_strided_slice %27 {offsets = [4, 0], sizes = [2, 128], strides = [1, 1]} : vector<16x128xf32> to vector<2x128xf32>
    %c2 = arith.constant 2 : index
    %c0_23 = arith.constant 0 : index
    %c0_24 = arith.constant 0 : index
    %37 = vector.load %arg11[%c2, %c0_23, %c0_24] : memref<8x2x128xf32, #tpu.memory_space<vmem>>, vector<1x2x128xf32>
    %38 = vector.shape_cast %37 : vector<1x2x128xf32> to vector<2x128xf32>
    %39 = vector.shape_cast %36 : vector<2x128xf32> to vector<1x2x128xf32>
    tpu.vector_store %arg11[%c2, %c0_23, %c0_24], %39 {strides = array<i32>} : memref<8x2x128xf32, #tpu.memory_space<vmem>>, vector<1x2x128xf32>,
    %40 = vector.extract_strided_slice %27 {offsets = [6, 0], sizes = [2, 128], strides = [1, 1]} : vector<16x128xf32> to vector<2x128xf32>
    %c3 = arith.constant 3 : index
    %c0_25 = arith.constant 0 : index
    %c0_26 = arith.constant 0 : index
    %41 = vector.load %arg11[%c3, %c0_25, %c0_26] : memref<8x2x128xf32, #tpu.memory_space<vmem>>, vector<1x2x128xf32>
    %42 = vector.shape_cast %41 : vector<1x2x128xf32> to vector<2x128xf32>
    %43 = vector.shape_cast %40 : vector<2x128xf32> to vector<1x2x128xf32>
    tpu.vector_store %arg11[%c3, %c0_25, %c0_26], %43 {strides = array<i32>} : memref<8x2x128xf32, #tpu.memory_space<vmem>>, vector<1x2x128xf32>,
    %44 = vector.extract_strided_slice %27 {offsets = [8, 0], sizes = [2, 128], strides = [1, 1]} : vector<16x128xf32> to vector<2x128xf32>
    %c4 = arith.constant 4 : index
    %c0_27 = arith.constant 0 : index
    %c0_28 = arith.constant 0 : index
    %45 = vector.load %arg11[%c4, %c0_27, %c0_28] : memref<8x2x128xf32, #tpu.memory_space<vmem>>, vector<1x2x128xf32>
    %46 = vector.shape_cast %45 : vector<1x2x128xf32> to vector<2x128xf32>
    %47 = vector.shape_cast %44 : vector<2x128xf32> to vector<1x2x128xf32>
    tpu.vector_store %arg11[%c4, %c0_27, %c0_28], %47 {strides = array<i32>} : memref<8x2x128xf32, #tpu.memory_space<vmem>>, vector<1x2x128xf32>,
    %48 = vector.extract_strided_slice %27 {offsets = [10, 0], sizes = [2, 128], strides = [1, 1]} : vector<16x128xf32> to vector<2x128xf32>
    %c5 = arith.constant 5 : index
    %c0_29 = arith.constant 0 : index
    %c0_30 = arith.constant 0 : index
    %49 = vector.load %arg11[%c5, %c0_29, %c0_30] : memref<8x2x128xf32, #tpu.memory_space<vmem>>, vector<1x2x128xf32>
    %50 = vector.shape_cast %49 : vector<1x2x128xf32> to vector<2x128xf32>
    %51 = vector.shape_cast %48 : vector<2x128xf32> to vector<1x2x128xf32>
    tpu.vector_store %arg11[%c5, %c0_29, %c0_30], %51 {strides = array<i32>} : memref<8x2x128xf32, #tpu.memory_space<vmem>>, vector<1x2x128xf32>,
    %52 = vector.extract_strided_slice %27 {offsets = [12, 0], sizes = [2, 128], strides = [1, 1]} : vector<16x128xf32> to vector<2x128xf32>
    %c6 = arith.constant 6 : index
    %c0_31 = arith.constant 0 : index
    %c0_32 = arith.constant 0 : index
    %53 = vector.load %arg11[%c6, %c0_31, %c0_32] : memref<8x2x128xf32, #tpu.memory_space<vmem>>, vector<1x2x128xf32>
    %54 = vector.shape_cast %53 : vector<1x2x128xf32> to vector<2x128xf32>
    %55 = vector.shape_cast %52 : vector<2x128xf32> to vector<1x2x128xf32>
    tpu.vector_store %arg11[%c6, %c0_31, %c0_32], %55 {strides = array<i32>} : memref<8x2x128xf32, #tpu.memory_space<vmem>>, vector<1x2x128xf32>,
    %56 = vector.extract_strided_slice %27 {offsets = [14, 0], sizes = [2, 128], strides = [1, 1]} : vector<16x128xf32> to vector<2x128xf32>
    %c7 = arith.constant 7 : index
    %c0_33 = arith.constant 0 : index
    %c0_34 = arith.constant 0 : index
    %57 = vector.load %arg11[%c7, %c0_33, %c0_34] : memref<8x2x128xf32, #tpu.memory_space<vmem>>, vector<1x2x128xf32>
    %58 = vector.shape_cast %57 : vector<1x2x128xf32> to vector<2x128xf32>
    %59 = vector.shape_cast %56 : vector<2x128xf32> to vector<1x2x128xf32>
    tpu.vector_store %arg11[%c7, %c0_33, %c0_34], %59 {strides = array<i32>} : memref<8x2x128xf32, #tpu.memory_space<vmem>>, vector<1x2x128xf32>,
    %cst_35 = arith.constant 0.000000e+00 : f32
    %60 = vector.broadcast %cst_35 : f32 to vector<2x32xf32>
    %cst_36 = arith.constant 0.000000e+00 : f32
    %61 = vector.broadcast %cst_36 : f32 to vector<2x32xf32>
    %c0_i32 = arith.constant 0 : i32
    %c0_i32_37 = arith.constant 0 : i32
    %62 = arith.cmpi eq, %arg0, %c0_i32_37 : i32
    %c7_i32 = arith.constant 7 : i32
    %63 = arith.subi %c7_i32, %c0_i32 : i32
    %64 = arith.select %62, %c0_i32, %63 : i32
    %65 = arith.index_cast %64 : i32 to index
    %c0_38 = arith.constant 0 : index
    %c0_39 = arith.constant 0 : index
    %66 = vector.load %arg11[%65, %c0_38, %c0_39] : memref<8x2x128xf32, #tpu.memory_space<vmem>>, vector<1x2x128xf32>
    %67 = vector.shape_cast %66 : vector<1x2x128xf32> to vector<2x128xf32>
    %c0_40 = arith.constant 0 : index
    %c0_41 = arith.constant 0 : index
    %c0_42 = arith.constant 0 : index
    %68 = vector.load %arg6[%c0_40, %c0_41, %c0_42] : memref<1x32x128xf32, #tpu.memory_space<vmem>>, vector<1x32x128xf32>
    %69 = vector.shape_cast %68 : vector<1x32x128xf32> to vector<32x128xf32>
    %cst_43 = arith.constant dense<0.000000e+00> : vector<2x128xf32>
    %70 = tpu.matmul %60, %69, %cst_43 {dimension_numbers = #tpu.dot_dimension_numbers<[1], [0], [0], [1], [0, 0, 1, 1], [], []>} : vector<2x32xf32>, vector<32x128xf32>, vector<2x128xf32> -> vector<2x128xf32>
    %71 = arith.addf %67, %70 : vector<2x128xf32>
    %72 = vector.extract_strided_slice %71 {offsets = [0, 0], sizes = [2, 32], strides = [1, 1]} : vector<2x128xf32> to vector<2x32xf32>
    %73 = arith.negf %72 : vector<2x32xf32>
    %74 = math.exp %73 : vector<2x32xf32>
    %cst_44 = arith.constant 1.000000e+00 : f32
    %75 = vector.broadcast %cst_44 : f32 to vector<2x32xf32>
    %76 = arith.addf %75, %74 : vector<2x32xf32>
    %77 = arith.divf %75, %76 : vector<2x32xf32>
    %78 = vector.extract_strided_slice %71 {offsets = [0, 32], sizes = [2, 32], strides = [1, 1]} : vector<2x128xf32> to vector<2x32xf32>
    %79 = arith.negf %78 : vector<2x32xf32>
    %80 = math.exp %79 : vector<2x32xf32>
    %cst_45 = arith.constant 1.000000e+00 : f32
    %81 = vector.broadcast %cst_45 : f32 to vector<2x32xf32>
    %82 = arith.addf %81, %80 : vector<2x32xf32>
    %83 = arith.divf %81, %82 : vector<2x32xf32>
    %84 = vector.extract_strided_slice %71 {offsets = [0, 64], sizes = [2, 32], strides = [1, 1]} : vector<2x128xf32> to vector<2x32xf32>
    %85 = math.tanh %84 : vector<2x32xf32>
    %86 = vector.extract_strided_slice %71 {offsets = [0, 96], sizes = [2, 32], strides = [1, 1]} : vector<2x128xf32> to vector<2x32xf32>
    %87 = arith.negf %86 : vector<2x32xf32>
    %88 = math.exp %87 : vector<2x32xf32>
    %cst_46 = arith.constant 1.000000e+00 : f32
    %89 = vector.broadcast %cst_46 : f32 to vector<2x32xf32>
    %90 = arith.addf %89, %88 : vector<2x32xf32>
    %91 = arith.divf %89, %90 : vector<2x32xf32>
    %92 = arith.mulf %83, %61 : vector<2x32xf32>
    %93 = arith.mulf %77, %85 : vector<2x32xf32>
    %94 = arith.addf %92, %93 : vector<2x32xf32>
    %95 = math.tanh %94 : vector<2x32xf32>
    %96 = arith.mulf %91, %95 : vector<2x32xf32>
    %c0_47 = arith.constant 0 : index
    %97 = arith.index_cast %64 : i32 to index
    %c0_48 = arith.constant 0 : index
    %c0_49 = arith.constant 0 : index
    %98 = vector.load %arg8[%c0_47, %97, %c0_48, %c0_49] : memref<1x8x2x32xf32, #tpu.memory_space<vmem>>, vector<1x1x2x32xf32>
    %99 = vector.shape_cast %98 : vector<1x1x2x32xf32> to vector<2x32xf32>
    %100 = vector.shape_cast %96 : vector<2x32xf32> to vector<1x1x2x32xf32>
    tpu.vector_store %arg8[%c0_47, %97, %c0_48, %c0_49], %100 {strides = array<i32>} : memref<1x8x2x32xf32, #tpu.memory_space<vmem>>, vector<1x1x2x32xf32>,
    %c1_i32 = arith.constant 1 : i32
    %c0_i32_50 = arith.constant 0 : i32
    %101 = arith.cmpi eq, %arg0, %c0_i32_50 : i32
    %c7_i32_51 = arith.constant 7 : i32
    %102 = arith.subi %c7_i32_51, %c1_i32 : i32
    %103 = arith.select %101, %c1_i32, %102 : i32
    %104 = arith.index_cast %103 : i32 to index
    %c0_52 = arith.constant 0 : index
    %c0_53 = arith.constant 0 : index
    %105 = vector.load %arg11[%104, %c0_52, %c0_53] : memref<8x2x128xf32, #tpu.memory_space<vmem>>, vector<1x2x128xf32>
    %106 = vector.shape_cast %105 : vector<1x2x128xf32> to vector<2x128xf32>
    %c0_54 = arith.constant 0 : index
    %c0_55 = arith.constant 0 : index
    %c0_56 = arith.constant 0 : index
    %107 = vector.load %arg6[%c0_54, %c0_55, %c0_56] : memref<1x32x128xf32, #tpu.memory_space<vmem>>, vector<1x32x128xf32>
    %108 = vector.shape_cast %107 : vector<1x32x128xf32> to vector<32x128xf32>
    %cst_57 = arith.constant dense<0.000000e+00> : vector<2x128xf32>
    %109 = tpu.matmul %96, %108, %cst_57 {dimension_numbers = #tpu.dot_dimension_numbers<[1], [0], [0], [1], [0, 0, 1, 1], [], []>} : vector<2x32xf32>, vector<32x128xf32>, vector<2x128xf32> -> vector<2x128xf32>
    %110 = arith.addf %106, %109 : vector<2x128xf32>
    %111 = vector.extract_strided_slice %110 {offsets = [0, 0], sizes = [2, 32], strides = [1, 1]} : vector<2x128xf32> to vector<2x32xf32>
    %112 = arith.negf %111 : vector<2x32xf32>
    %113 = math.exp %112 : vector<2x32xf32>
    %cst_58 = arith.constant 1.000000e+00 : f32
    %114 = vector.broadcast %cst_58 : f32 to vector<2x32xf32>
    %115 = arith.addf %114, %113 : vector<2x32xf32>
    %116 = arith.divf %114, %115 : vector<2x32xf32>
    %117 = vector.extract_strided_slice %110 {offsets = [0, 32], sizes = [2, 32], strides = [1, 1]} : vector<2x128xf32> to vector<2x32xf32>
    %118 = arith.negf %117 : vector<2x32xf32>
    %119 = math.exp %118 : vector<2x32xf32>
    %cst_59 = arith.constant 1.000000e+00 : f32
    %120 = vector.broadcast %cst_59 : f32 to vector<2x32xf32>
    %121 = arith.addf %120, %119 : vector<2x32xf32>
    %122 = arith.divf %120, %121 : vector<2x32xf32>
    %123 = vector.extract_strided_slice %110 {offsets = [0, 64], sizes = [2, 32], strides = [1, 1]} : vector<2x128xf32> to vector<2x32xf32>
    %124 = math.tanh %123 : vector<2x32xf32>
    %125 = vector.extract_strided_slice %110 {offsets = [0, 96], sizes = [2, 32], strides = [1, 1]} : vector<2x128xf32> to vector<2x32xf32>
    %126 = arith.negf %125 : vector<2x32xf32>
    %127 = math.exp %126 : vector<2x32xf32>
    %cst_60 = arith.constant 1.000000e+00 : f32
    %128 = vector.broadcast %cst_60 : f32 to vector<2x32xf32>
    %129 = arith.addf %128, %127 : vector<2x32xf32>
    %130 = arith.divf %128, %129 : vector<2x32xf32>
    %131 = arith.mulf %122, %94 : vector<2x32xf32>
    %132 = arith.mulf %116, %124 : vector<2x32xf32>
    %133 = arith.addf %131, %132 : vector<2x32xf32>
    %134 = math.tanh %133 : vector<2x32xf32>
    %135 = arith.mulf %130, %134 : vector<2x32xf32>
    %c0_61 = arith.constant 0 : index
    %136 = arith.index_cast %103 : i32 to index
    %c0_62 = arith.constant 0 : index
    %c0_63 = arith.constant 0 : index
    %137 = vector.load %arg8[%c0_61, %136, %c0_62, %c0_63] : memref<1x8x2x32xf32, #tpu.memory_space<vmem>>, vector<1x1x2x32xf32>
    %138 = vector.shape_cast %137 : vector<1x1x2x32xf32> to vector<2x32xf32>
    %139 = vector.shape_cast %135 : vector<2x32xf32> to vector<1x1x2x32xf32>
    tpu.vector_store %arg8[%c0_61, %136, %c0_62, %c0_63], %139 {strides = array<i32>} : memref<1x8x2x32xf32, #tpu.memory_space<vmem>>, vector<1x1x2x32xf32>,
    %c2_i32 = arith.constant 2 : i32
    %c0_i32_64 = arith.constant 0 : i32
    %140 = arith.cmpi eq, %arg0, %c0_i32_64 : i32
    %c7_i32_65 = arith.constant 7 : i32
    %141 = arith.subi %c7_i32_65, %c2_i32 : i32
    %142 = arith.select %140, %c2_i32, %141 : i32
    %143 = arith.index_cast %142 : i32 to index
    %c0_66 = arith.constant 0 : index
    %c0_67 = arith.constant 0 : index
    %144 = vector.load %arg11[%143, %c0_66, %c0_67] : memref<8x2x128xf32, #tpu.memory_space<vmem>>, vector<1x2x128xf32>
    %145 = vector.shape_cast %144 : vector<1x2x128xf32> to vector<2x128xf32>
    %c0_68 = arith.constant 0 : index
    %c0_69 = arith.constant 0 : index
    %c0_70 = arith.constant 0 : index
    %146 = vector.load %arg6[%c0_68, %c0_69, %c0_70] : memref<1x32x128xf32, #tpu.memory_space<vmem>>, vector<1x32x128xf32>
    %147 = vector.shape_cast %146 : vector<1x32x128xf32> to vector<32x128xf32>
    %cst_71 = arith.constant dense<0.000000e+00> : vector<2x128xf32>
    %148 = tpu.matmul %135, %147, %cst_71 {dimension_numbers = #tpu.dot_dimension_numbers<[1], [0], [0], [1], [0, 0, 1, 1], [], []>} : vector<2x32xf32>, vector<32x128xf32>, vector<2x128xf32> -> vector<2x128xf32>
    %149 = arith.addf %145, %148 : vector<2x128xf32>
    %150 = vector.extract_strided_slice %149 {offsets = [0, 0], sizes = [2, 32], strides = [1, 1]} : vector<2x128xf32> to vector<2x32xf32>
    %151 = arith.negf %150 : vector<2x32xf32>
    %152 = math.exp %151 : vector<2x32xf32>
    %cst_72 = arith.constant 1.000000e+00 : f32
    %153 = vector.broadcast %cst_72 : f32 to vector<2x32xf32>
    %154 = arith.addf %153, %152 : vector<2x32xf32>
    %155 = arith.divf %153, %154 : vector<2x32xf32>
    %156 = vector.extract_strided_slice %149 {offsets = [0, 32], sizes = [2, 32], strides = [1, 1]} : vector<2x128xf32> to vector<2x32xf32>
    %157 = arith.negf %156 : vector<2x32xf32>
    %158 = math.exp %157 : vector<2x32xf32>
    %cst_73 = arith.constant 1.000000e+00 : f32
    %159 = vector.broadcast %cst_73 : f32 to vector<2x32xf32>
    %160 = arith.addf %159, %158 : vector<2x32xf32>
    %161 = arith.divf %159, %160 : vector<2x32xf32>
    %162 = vector.extract_strided_slice %149 {offsets = [0, 64], sizes = [2, 32], strides = [1, 1]} : vector<2x128xf32> to vector<2x32xf32>
    %163 = math.tanh %162 : vector<2x32xf32>
    %164 = vector.extract_strided_slice %149 {offsets = [0, 96], sizes = [2, 32], strides = [1, 1]} : vector<2x128xf32> to vector<2x32xf32>
    %165 = arith.negf %164 : vector<2x32xf32>
    %166 = math.exp %165 : vector<2x32xf32>
    %cst_74 = arith.constant 1.000000e+00 : f32
    %167 = vector.broadcast %cst_74 : f32 to vector<2x32xf32>
    %168 = arith.addf %167, %166 : vector<2x32xf32>
    %169 = arith.divf %167, %168 : vector<2x32xf32>
    %170 = arith.mulf %161, %133 : vector<2x32xf32>
    %171 = arith.mulf %155, %163 : vector<2x32xf32>
    %172 = arith.addf %170, %171 : vector<2x32xf32>
    %173 = math.tanh %172 : vector<2x32xf32>
    %174 = arith.mulf %169, %173 : vector<2x32xf32>
    %c0_75 = arith.constant 0 : index
    %175 = arith.index_cast %142 : i32 to index
    %c0_76 = arith.constant 0 : index
    %c0_77 = arith.constant 0 : index
    %176 = vector.load %arg8[%c0_75, %175, %c0_76, %c0_77] : memref<1x8x2x32xf32, #tpu.memory_space<vmem>>, vector<1x1x2x32xf32>
    %177 = vector.shape_cast %176 : vector<1x1x2x32xf32> to vector<2x32xf32>
    %178 = vector.shape_cast %174 : vector<2x32xf32> to vector<1x1x2x32xf32>
    tpu.vector_store %arg8[%c0_75, %175, %c0_76, %c0_77], %178 {strides = array<i32>} : memref<1x8x2x32xf32, #tpu.memory_space<vmem>>, vector<1x1x2x32xf32>,
    %c3_i32 = arith.constant 3 : i32
    %c0_i32_78 = arith.constant 0 : i32
    %179 = arith.cmpi eq, %arg0, %c0_i32_78 : i32
    %c7_i32_79 = arith.constant 7 : i32
    %180 = arith.subi %c7_i32_79, %c3_i32 : i32
    %181 = arith.select %179, %c3_i32, %180 : i32
    %182 = arith.index_cast %181 : i32 to index
    %c0_80 = arith.constant 0 : index
    %c0_81 = arith.constant 0 : index
    %183 = vector.load %arg11[%182, %c0_80, %c0_81] : memref<8x2x128xf32, #tpu.memory_space<vmem>>, vector<1x2x128xf32>
    %184 = vector.shape_cast %183 : vector<1x2x128xf32> to vector<2x128xf32>
    %c0_82 = arith.constant 0 : index
    %c0_83 = arith.constant 0 : index
    %c0_84 = arith.constant 0 : index
    %185 = vector.load %arg6[%c0_82, %c0_83, %c0_84] : memref<1x32x128xf32, #tpu.memory_space<vmem>>, vector<1x32x128xf32>
    %186 = vector.shape_cast %185 : vector<1x32x128xf32> to vector<32x128xf32>
    %cst_85 = arith.constant dense<0.000000e+00> : vector<2x128xf32>
    %187 = tpu.matmul %174, %186, %cst_85 {dimension_numbers = #tpu.dot_dimension_numbers<[1], [0], [0], [1], [0, 0, 1, 1], [], []>} : vector<2x32xf32>, vector<32x128xf32>, vector<2x128xf32> -> vector<2x128xf32>
    %188 = arith.addf %184, %187 : vector<2x128xf32>
    %189 = vector.extract_strided_slice %188 {offsets = [0, 0], sizes = [2, 32], strides = [1, 1]} : vector<2x128xf32> to vector<2x32xf32>
    %190 = arith.negf %189 : vector<2x32xf32>
    %191 = math.exp %190 : vector<2x32xf32>
    %cst_86 = arith.constant 1.000000e+00 : f32
    %192 = vector.broadcast %cst_86 : f32 to vector<2x32xf32>
    %193 = arith.addf %192, %191 : vector<2x32xf32>
    %194 = arith.divf %192, %193 : vector<2x32xf32>
    %195 = vector.extract_strided_slice %188 {offsets = [0, 32], sizes = [2, 32], strides = [1, 1]} : vector<2x128xf32> to vector<2x32xf32>
    %196 = arith.negf %195 : vector<2x32xf32>
    %197 = math.exp %196 : vector<2x32xf32>
    %cst_87 = arith.constant 1.000000e+00 : f32
    %198 = vector.broadcast %cst_87 : f32 to vector<2x32xf32>
    %199 = arith.addf %198, %197 : vector<2x32xf32>
    %200 = arith.divf %198, %199 : vector<2x32xf32>
    %201 = vector.extract_strided_slice %188 {offsets = [0, 64], sizes = [2, 32], strides = [1, 1]} : vector<2x128xf32> to vector<2x32xf32>
    %202 = math.tanh %201 : vector<2x32xf32>
    %203 = vector.extract_strided_slice %188 {offsets = [0, 96], sizes = [2, 32], strides = [1, 1]} : vector<2x128xf32> to vector<2x32xf32>
    %204 = arith.negf %203 : vector<2x32xf32>
    %205 = math.exp %204 : vector<2x32xf32>
    %cst_88 = arith.constant 1.000000e+00 : f32
    %206 = vector.broadcast %cst_88 : f32 to vector<2x32xf32>
    %207 = arith.addf %206, %205 : vector<2x32xf32>
    %208 = arith.divf %206, %207 : vector<2x32xf32>
    %209 = arith.mulf %200, %172 : vector<2x32xf32>
    %210 = arith.mulf %194, %202 : vector<2x32xf32>
    %211 = arith.addf %209, %210 : vector<2x32xf32>
    %212 = math.tanh %211 : vector<2x32xf32>
    %213 = arith.mulf %208, %212 : vector<2x32xf32>
    %c0_89 = arith.constant 0 : index
    %214 = arith.index_cast %181 : i32 to index
    %c0_90 = arith.constant 0 : index
    %c0_91 = arith.constant 0 : index
    %215 = vector.load %arg8[%c0_89, %214, %c0_90, %c0_91] : memref<1x8x2x32xf32, #tpu.memory_space<vmem>>, vector<1x1x2x32xf32>
    %216 = vector.shape_cast %215 : vector<1x1x2x32xf32> to vector<2x32xf32>
    %217 = vector.shape_cast %213 : vector<2x32xf32> to vector<1x1x2x32xf32>
    tpu.vector_store %arg8[%c0_89, %214, %c0_90, %c0_91], %217 {strides = array<i32>} : memref<1x8x2x32xf32, #tpu.memory_space<vmem>>, vector<1x1x2x32xf32>,
    %c4_i32 = arith.constant 4 : i32
    %c0_i32_92 = arith.constant 0 : i32
    %218 = arith.cmpi eq, %arg0, %c0_i32_92 : i32
    %c7_i32_93 = arith.constant 7 : i32
    %219 = arith.subi %c7_i32_93, %c4_i32 : i32
    %220 = arith.select %218, %c4_i32, %219 : i32
    %221 = arith.index_cast %220 : i32 to index
    %c0_94 = arith.constant 0 : index
    %c0_95 = arith.constant 0 : index
    %222 = vector.load %arg11[%221, %c0_94, %c0_95] : memref<8x2x128xf32, #tpu.memory_space<vmem>>, vector<1x2x128xf32>
    %223 = vector.shape_cast %222 : vector<1x2x128xf32> to vector<2x128xf32>
    %c0_96 = arith.constant 0 : index
    %c0_97 = arith.constant 0 : index
    %c0_98 = arith.constant 0 : index
    %224 = vector.load %arg6[%c0_96, %c0_97, %c0_98] : memref<1x32x128xf32, #tpu.memory_space<vmem>>, vector<1x32x128xf32>
    %225 = vector.shape_cast %224 : vector<1x32x128xf32> to vector<32x128xf32>
    %cst_99 = arith.constant dense<0.000000e+00> : vector<2x128xf32>
    %226 = tpu.matmul %213, %225, %cst_99 {dimension_numbers = #tpu.dot_dimension_numbers<[1], [0], [0], [1], [0, 0, 1, 1], [], []>} : vector<2x32xf32>, vector<32x128xf32>, vector<2x128xf32> -> vector<2x128xf32>
    %227 = arith.addf %223, %226 : vector<2x128xf32>
    %228 = vector.extract_strided_slice %227 {offsets = [0, 0], sizes = [2, 32], strides = [1, 1]} : vector<2x128xf32> to vector<2x32xf32>
    %229 = arith.negf %228 : vector<2x32xf32>
    %230 = math.exp %229 : vector<2x32xf32>
    %cst_100 = arith.constant 1.000000e+00 : f32
    %231 = vector.broadcast %cst_100 : f32 to vector<2x32xf32>
    %232 = arith.addf %231, %230 : vector<2x32xf32>
    %233 = arith.divf %231, %232 : vector<2x32xf32>
    %234 = vector.extract_strided_slice %227 {offsets = [0, 32], sizes = [2, 32], strides = [1, 1]} : vector<2x128xf32> to vector<2x32xf32>
    %235 = arith.negf %234 : vector<2x32xf32>
    %236 = math.exp %235 : vector<2x32xf32>
    %cst_101 = arith.constant 1.000000e+00 : f32
    %237 = vector.broadcast %cst_101 : f32 to vector<2x32xf32>
    %238 = arith.addf %237, %236 : vector<2x32xf32>
    %239 = arith.divf %237, %238 : vector<2x32xf32>
    %240 = vector.extract_strided_slice %227 {offsets = [0, 64], sizes = [2, 32], strides = [1, 1]} : vector<2x128xf32> to vector<2x32xf32>
    %241 = math.tanh %240 : vector<2x32xf32>
    %242 = vector.extract_strided_slice %227 {offsets = [0, 96], sizes = [2, 32], strides = [1, 1]} : vector<2x128xf32> to vector<2x32xf32>
    %243 = arith.negf %242 : vector<2x32xf32>
    %244 = math.exp %243 : vector<2x32xf32>
    %cst_102 = arith.constant 1.000000e+00 : f32
    %245 = vector.broadcast %cst_102 : f32 to vector<2x32xf32>
    %246 = arith.addf %245, %244 : vector<2x32xf32>
    %247 = arith.divf %245, %246 : vector<2x32xf32>
    %248 = arith.mulf %239, %211 : vector<2x32xf32>
    %249 = arith.mulf %233, %241 : vector<2x32xf32>
    %250 = arith.addf %248, %249 : vector<2x32xf32>
    %251 = math.tanh %250 : vector<2x32xf32>
    %252 = arith.mulf %247, %251 : vector<2x32xf32>
    %c0_103 = arith.constant 0 : index
    %253 = arith.index_cast %220 : i32 to index
    %c0_104 = arith.constant 0 : index
    %c0_105 = arith.constant 0 : index
    %254 = vector.load %arg8[%c0_103, %253, %c0_104, %c0_105] : memref<1x8x2x32xf32, #tpu.memory_space<vmem>>, vector<1x1x2x32xf32>
    %255 = vector.shape_cast %254 : vector<1x1x2x32xf32> to vector<2x32xf32>
    %256 = vector.shape_cast %252 : vector<2x32xf32> to vector<1x1x2x32xf32>
    tpu.vector_store %arg8[%c0_103, %253, %c0_104, %c0_105], %256 {strides = array<i32>} : memref<1x8x2x32xf32, #tpu.memory_space<vmem>>, vector<1x1x2x32xf32>,
    %c5_i32 = arith.constant 5 : i32
    %c0_i32_106 = arith.constant 0 : i32
    %257 = arith.cmpi eq, %arg0, %c0_i32_106 : i32
    %c7_i32_107 = arith.constant 7 : i32
    %258 = arith.subi %c7_i32_107, %c5_i32 : i32
    %259 = arith.select %257, %c5_i32, %258 : i32
    %260 = arith.index_cast %259 : i32 to index
    %c0_108 = arith.constant 0 : index
    %c0_109 = arith.constant 0 : index
    %261 = vector.load %arg11[%260, %c0_108, %c0_109] : memref<8x2x128xf32, #tpu.memory_space<vmem>>, vector<1x2x128xf32>
    %262 = vector.shape_cast %261 : vector<1x2x128xf32> to vector<2x128xf32>
    %c0_110 = arith.constant 0 : index
    %c0_111 = arith.constant 0 : index
    %c0_112 = arith.constant 0 : index
    %263 = vector.load %arg6[%c0_110, %c0_111, %c0_112] : memref<1x32x128xf32, #tpu.memory_space<vmem>>, vector<1x32x128xf32>
    %264 = vector.shape_cast %263 : vector<1x32x128xf32> to vector<32x128xf32>
    %cst_113 = arith.constant dense<0.000000e+00> : vector<2x128xf32>
    %265 = tpu.matmul %252, %264, %cst_113 {dimension_numbers = #tpu.dot_dimension_numbers<[1], [0], [0], [1], [0, 0, 1, 1], [], []>} : vector<2x32xf32>, vector<32x128xf32>, vector<2x128xf32> -> vector<2x128xf32>
    %266 = arith.addf %262, %265 : vector<2x128xf32>
    %267 = vector.extract_strided_slice %266 {offsets = [0, 0], sizes = [2, 32], strides = [1, 1]} : vector<2x128xf32> to vector<2x32xf32>
    %268 = arith.negf %267 : vector<2x32xf32>
    %269 = math.exp %268 : vector<2x32xf32>
    %cst_114 = arith.constant 1.000000e+00 : f32
    %270 = vector.broadcast %cst_114 : f32 to vector<2x32xf32>
    %271 = arith.addf %270, %269 : vector<2x32xf32>
    %272 = arith.divf %270, %271 : vector<2x32xf32>
    %273 = vector.extract_strided_slice %266 {offsets = [0, 32], sizes = [2, 32], strides = [1, 1]} : vector<2x128xf32> to vector<2x32xf32>
    %274 = arith.negf %273 : vector<2x32xf32>
    %275 = math.exp %274 : vector<2x32xf32>
    %cst_115 = arith.constant 1.000000e+00 : f32
    %276 = vector.broadcast %cst_115 : f32 to vector<2x32xf32>
    %277 = arith.addf %276, %275 : vector<2x32xf32>
    %278 = arith.divf %276, %277 : vector<2x32xf32>
    %279 = vector.extract_strided_slice %266 {offsets = [0, 64], sizes = [2, 32], strides = [1, 1]} : vector<2x128xf32> to vector<2x32xf32>
    %280 = math.tanh %279 : vector<2x32xf32>
    %281 = vector.extract_strided_slice %266 {offsets = [0, 96], sizes = [2, 32], strides = [1, 1]} : vector<2x128xf32> to vector<2x32xf32>
    %282 = arith.negf %281 : vector<2x32xf32>
    %283 = math.exp %282 : vector<2x32xf32>
    %cst_116 = arith.constant 1.000000e+00 : f32
    %284 = vector.broadcast %cst_116 : f32 to vector<2x32xf32>
    %285 = arith.addf %284, %283 : vector<2x32xf32>
    %286 = arith.divf %284, %285 : vector<2x32xf32>
    %287 = arith.mulf %278, %250 : vector<2x32xf32>
    %288 = arith.mulf %272, %280 : vector<2x32xf32>
    %289 = arith.addf %287, %288 : vector<2x32xf32>
    %290 = math.tanh %289 : vector<2x32xf32>
    %291 = arith.mulf %286, %290 : vector<2x32xf32>
    %c0_117 = arith.constant 0 : index
    %292 = arith.index_cast %259 : i32 to index
    %c0_118 = arith.constant 0 : index
    %c0_119 = arith.constant 0 : index
    %293 = vector.load %arg8[%c0_117, %292, %c0_118, %c0_119] : memref<1x8x2x32xf32, #tpu.memory_space<vmem>>, vector<1x1x2x32xf32>
    %294 = vector.shape_cast %293 : vector<1x1x2x32xf32> to vector<2x32xf32>
    %295 = vector.shape_cast %291 : vector<2x32xf32> to vector<1x1x2x32xf32>
    tpu.vector_store %arg8[%c0_117, %292, %c0_118, %c0_119], %295 {strides = array<i32>} : memref<1x8x2x32xf32, #tpu.memory_space<vmem>>, vector<1x1x2x32xf32>,
    %c6_i32 = arith.constant 6 : i32
    %c0_i32_120 = arith.constant 0 : i32
    %296 = arith.cmpi eq, %arg0, %c0_i32_120 : i32
    %c7_i32_121 = arith.constant 7 : i32
    %297 = arith.subi %c7_i32_121, %c6_i32 : i32
    %298 = arith.select %296, %c6_i32, %297 : i32
    %299 = arith.index_cast %298 : i32 to index
    %c0_122 = arith.constant 0 : index
    %c0_123 = arith.constant 0 : index
    %300 = vector.load %arg11[%299, %c0_122, %c0_123] : memref<8x2x128xf32, #tpu.memory_space<vmem>>, vector<1x2x128xf32>
    %301 = vector.shape_cast %300 : vector<1x2x128xf32> to vector<2x128xf32>
    %c0_124 = arith.constant 0 : index
    %c0_125 = arith.constant 0 : index
    %c0_126 = arith.constant 0 : index
    %302 = vector.load %arg6[%c0_124, %c0_125, %c0_126] : memref<1x32x128xf32, #tpu.memory_space<vmem>>, vector<1x32x128xf32>
    %303 = vector.shape_cast %302 : vector<1x32x128xf32> to vector<32x128xf32>
    %cst_127 = arith.constant dense<0.000000e+00> : vector<2x128xf32>
    %304 = tpu.matmul %291, %303, %cst_127 {dimension_numbers = #tpu.dot_dimension_numbers<[1], [0], [0], [1], [0, 0, 1, 1], [], []>} : vector<2x32xf32>, vector<32x128xf32>, vector<2x128xf32> -> vector<2x128xf32>
    %305 = arith.addf %301, %304 : vector<2x128xf32>
    %306 = vector.extract_strided_slice %305 {offsets = [0, 0], sizes = [2, 32], strides = [1, 1]} : vector<2x128xf32> to vector<2x32xf32>
    %307 = arith.negf %306 : vector<2x32xf32>
    %308 = math.exp %307 : vector<2x32xf32>
    %cst_128 = arith.constant 1.000000e+00 : f32
    %309 = vector.broadcast %cst_128 : f32 to vector<2x32xf32>
    %310 = arith.addf %309, %308 : vector<2x32xf32>
    %311 = arith.divf %309, %310 : vector<2x32xf32>
    %312 = vector.extract_strided_slice %305 {offsets = [0, 32], sizes = [2, 32], strides = [1, 1]} : vector<2x128xf32> to vector<2x32xf32>
    %313 = arith.negf %312 : vector<2x32xf32>
    %314 = math.exp %313 : vector<2x32xf32>
    %cst_129 = arith.constant 1.000000e+00 : f32
    %315 = vector.broadcast %cst_129 : f32 to vector<2x32xf32>
    %316 = arith.addf %315, %314 : vector<2x32xf32>
    %317 = arith.divf %315, %316 : vector<2x32xf32>
    %318 = vector.extract_strided_slice %305 {offsets = [0, 64], sizes = [2, 32], strides = [1, 1]} : vector<2x128xf32> to vector<2x32xf32>
    %319 = math.tanh %318 : vector<2x32xf32>
    %320 = vector.extract_strided_slice %305 {offsets = [0, 96], sizes = [2, 32], strides = [1, 1]} : vector<2x128xf32> to vector<2x32xf32>
    %321 = arith.negf %320 : vector<2x32xf32>
    %322 = math.exp %321 : vector<2x32xf32>
    %cst_130 = arith.constant 1.000000e+00 : f32
    %323 = vector.broadcast %cst_130 : f32 to vector<2x32xf32>
    %324 = arith.addf %323, %322 : vector<2x32xf32>
    %325 = arith.divf %323, %324 : vector<2x32xf32>
    %326 = arith.mulf %317, %289 : vector<2x32xf32>
    %327 = arith.mulf %311, %319 : vector<2x32xf32>
    %328 = arith.addf %326, %327 : vector<2x32xf32>
    %329 = math.tanh %328 : vector<2x32xf32>
    %330 = arith.mulf %325, %329 : vector<2x32xf32>
    %c0_131 = arith.constant 0 : index
    %331 = arith.index_cast %298 : i32 to index
    %c0_132 = arith.constant 0 : index
    %c0_133 = arith.constant 0 : index
    %332 = vector.load %arg8[%c0_131, %331, %c0_132, %c0_133] : memref<1x8x2x32xf32, #tpu.memory_space<vmem>>, vector<1x1x2x32xf32>
    %333 = vector.shape_cast %332 : vector<1x1x2x32xf32> to vector<2x32xf32>
    %334 = vector.shape_cast %330 : vector<2x32xf32> to vector<1x1x2x32xf32>
    tpu.vector_store %arg8[%c0_131, %331, %c0_132, %c0_133], %334 {strides = array<i32>} : memref<1x8x2x32xf32, #tpu.memory_space<vmem>>, vector<1x1x2x32xf32>,
    %c7_i32_134 = arith.constant 7 : i32
    %c0_i32_135 = arith.constant 0 : i32
    %335 = arith.cmpi eq, %arg0, %c0_i32_135 : i32
    %c7_i32_136 = arith.constant 7 : i32
    %336 = arith.subi %c7_i32_136, %c7_i32_134 : i32
    %337 = arith.select %335, %c7_i32_134, %336 : i32
    %338 = arith.index_cast %337 : i32 to index
    %c0_137 = arith.constant 0 : index
    %c0_138 = arith.constant 0 : index
    %339 = vector.load %arg11[%338, %c0_137, %c0_138] : memref<8x2x128xf32, #tpu.memory_space<vmem>>, vector<1x2x128xf32>
    %340 = vector.shape_cast %339 : vector<1x2x128xf32> to vector<2x128xf32>
    %c0_139 = arith.constant 0 : index
    %c0_140 = arith.constant 0 : index
    %c0_141 = arith.constant 0 : index
    %341 = vector.load %arg6[%c0_139, %c0_140, %c0_141] : memref<1x32x128xf32, #tpu.memory_space<vmem>>, vector<1x32x128xf32>
    %342 = vector.shape_cast %341 : vector<1x32x128xf32> to vector<32x128xf32>
    %cst_142 = arith.constant dense<0.000000e+00> : vector<2x128xf32>
    %343 = tpu.matmul %330, %342, %cst_142 {dimension_numbers = #tpu.dot_dimension_numbers<[1], [0], [0], [1], [0, 0, 1, 1], [], []>} : vector<2x32xf32>, vector<32x128xf32>, vector<2x128xf32> -> vector<2x128xf32>
    %344 = arith.addf %340, %343 : vector<2x128xf32>
    %345 = vector.extract_strided_slice %344 {offsets = [0, 0], sizes = [2, 32], strides = [1, 1]} : vector<2x128xf32> to vector<2x32xf32>
    %346 = arith.negf %345 : vector<2x32xf32>
    %347 = math.exp %346 : vector<2x32xf32>
    %cst_143 = arith.constant 1.000000e+00 : f32
    %348 = vector.broadcast %cst_143 : f32 to vector<2x32xf32>
    %349 = arith.addf %348, %347 : vector<2x32xf32>
    %350 = arith.divf %348, %349 : vector<2x32xf32>
    %351 = vector.extract_strided_slice %344 {offsets = [0, 32], sizes = [2, 32], strides = [1, 1]} : vector<2x128xf32> to vector<2x32xf32>
    %352 = arith.negf %351 : vector<2x32xf32>
    %353 = math.exp %352 : vector<2x32xf32>
    %cst_144 = arith.constant 1.000000e+00 : f32
    %354 = vector.broadcast %cst_144 : f32 to vector<2x32xf32>
    %355 = arith.addf %354, %353 : vector<2x32xf32>
    %356 = arith.divf %354, %355 : vector<2x32xf32>
    %357 = vector.extract_strided_slice %344 {offsets = [0, 64], sizes = [2, 32], strides = [1, 1]} : vector<2x128xf32> to vector<2x32xf32>
    %358 = math.tanh %357 : vector<2x32xf32>
    %359 = vector.extract_strided_slice %344 {offsets = [0, 96], sizes = [2, 32], strides = [1, 1]} : vector<2x128xf32> to vector<2x32xf32>
    %360 = arith.negf %359 : vector<2x32xf32>
    %361 = math.exp %360 : vector<2x32xf32>
    %cst_145 = arith.constant 1.000000e+00 : f32
    %362 = vector.broadcast %cst_145 : f32 to vector<2x32xf32>
    %363 = arith.addf %362, %361 : vector<2x32xf32>
    %364 = arith.divf %362, %363 : vector<2x32xf32>
    %365 = arith.mulf %356, %328 : vector<2x32xf32>
    %366 = arith.mulf %350, %358 : vector<2x32xf32>
    %367 = arith.addf %365, %366 : vector<2x32xf32>
    %368 = math.tanh %367 : vector<2x32xf32>
    %369 = arith.mulf %364, %368 : vector<2x32xf32>
    %c0_146 = arith.constant 0 : index
    %370 = arith.index_cast %337 : i32 to index
    %c0_147 = arith.constant 0 : index
    %c0_148 = arith.constant 0 : index
    %371 = vector.load %arg8[%c0_146, %370, %c0_147, %c0_148] : memref<1x8x2x32xf32, #tpu.memory_space<vmem>>, vector<1x1x2x32xf32>
    %372 = vector.shape_cast %371 : vector<1x1x2x32xf32> to vector<2x32xf32>
    %373 = vector.shape_cast %369 : vector<2x32xf32> to vector<1x1x2x32xf32>
    tpu.vector_store %arg8[%c0_146, %370, %c0_147, %c0_148], %373 {strides = array<i32>} : memref<1x8x2x32xf32, #tpu.memory_space<vmem>>, vector<1x1x2x32xf32>,
    %c8_i32 = arith.constant 8 : i32
    %c0_149 = arith.constant 0 : index
    %c0_150 = arith.constant 0 : index
    %c0_151 = arith.constant 0 : index
    %374 = vector.load %arg9[%c0_149, %c0_150, %c0_151] : memref<1x2x32xf32, #tpu.memory_space<vmem>>, vector<1x2x32xf32>
    %375 = vector.shape_cast %374 : vector<1x2x32xf32> to vector<2x32xf32>
    %376 = vector.shape_cast %369 : vector<2x32xf32> to vector<1x2x32xf32>
    tpu.vector_store %arg9[%c0_149, %c0_150, %c0_151], %376 {strides = array<i32>} : memref<1x2x32xf32, #tpu.memory_space<vmem>>, vector<1x2x32xf32>,
    %c0_152 = arith.constant 0 : index
    %c0_153 = arith.constant 0 : index
    %c0_154 = arith.constant 0 : index
    %377 = vector.load %arg10[%c0_152, %c0_153, %c0_154] : memref<1x2x32xf32, #tpu.memory_space<vmem>>, vector<1x2x32xf32>
    %378 = vector.shape_cast %377 : vector<1x2x32xf32> to vector<2x32xf32>
    %379 = vector.shape_cast %367 : vector<2x32xf32> to vector<1x2x32xf32>
    tpu.vector_store %arg10[%c0_152, %c0_153, %c0_154], %379 {strides = array<i32>} : memref<1x2x32xf32, #tpu.memory_space<vmem>>, vector<1x2x32xf32>,
    return
  }
  func.func @transform_0(%arg0: i32) -> (i32, i32) {
    %c0_i32 = arith.constant 0 : i32
    %c0_i32_0 = arith.constant 0 : i32
    %c0_i32_1 = arith.constant 0 : i32
    return %c0_i32, %c0_i32_0 : i32, i32
  }
  func.func @transform_1(%arg0: i32) -> (i32, i32) {
    %c0_i32 = arith.constant 0 : i32
    %c0_i32_0 = arith.constant 0 : i32
    %c0_i32_1 = arith.constant 0 : i32
    return %c0_i32, %c0_i32_0 : i32, i32
  }
  func.func @transform_2(%arg0: i32) -> (i32, i32) {
    %c0_i32 = arith.constant 0 : i32
    %c0_i32_0 = arith.constant 0 : i32
    %c0_i32_1 = arith.constant 0 : i32
    return %c0_i32, %c0_i32_0 : i32, i32
  }
  func.func @transform_3(%arg0: i32) -> (i32, i32) {
    %c0_i32 = arith.constant 0 : i32
    %c0_i32_0 = arith.constant 0 : i32
    %c0_i32_1 = arith.constant 0 : i32
    return %c0_i32, %c0_i32_0 : i32, i32
  }
  func.func @transform_4(%arg0: i32) -> (i32, i32, i32) {
    %c0_i32 = arith.constant 0 : i32
    %c0_i32_0 = arith.constant 0 : i32
    %c0_i32_1 = arith.constant 0 : i32
    return %arg0, %c0_i32, %c0_i32_0 : i32, i32, i32
  }
  func.func @transform_5(%arg0: i32) -> (i32, i32, i32) {
    %c0_i32 = arith.constant 0 : i32
    %c0_i32_0 = arith.constant 0 : i32
    %c0_i32_1 = arith.constant 0 : i32
    return %arg0, %c0_i32, %c0_i32_0 : i32, i32, i32
  }
  func.func @transform_6(%arg0: i32) -> (i32, i32, i32) {
    %c0_i32 = arith.constant 0 : i32
    %c0_i32_0 = arith.constant 0 : i32
    %c0_i32_1 = arith.constant 0 : i32
    return %arg0, %c0_i32, %c0_i32_0 : i32, i32, i32
  }
  func.func @transform_7(%arg0: i32) -> (i32, i32, i32, i32) {
    %c0_i32 = arith.constant 0 : i32
    %c0_i32_0 = arith.constant 0 : i32
    %c0_i32_1 = arith.constant 0 : i32
    %c0_i32_2 = arith.constant 0 : i32
    return %arg0, %c0_i32, %c0_i32_0, %c0_i32_1 : i32, i32, i32, i32
  }
  func.func @transform_8(%arg0: i32) -> (i32, i32, i32) {
    %c0_i32 = arith.constant 0 : i32
    %c0_i32_0 = arith.constant 0 : i32
    %c0_i32_1 = arith.constant 0 : i32
    return %arg0, %c0_i32, %c0_i32_0 : i32, i32, i32
  }
  func.func @transform_9(%arg0: i32) -> (i32, i32, i32) {
    %c0_i32 = arith.constant 0 : i32
    %c0_i32_0 = arith.constant 0 : i32
    %c0_i32_1 = arith.constant 0 : i32
    return %arg0, %c0_i32, %c0_i32_0 : i32, i32, i32
  }
}

</mosaic_0001>

<bundles_post_ra>
// kernel: tpu_custom_call.1
= control target key start
LH: loop header
LB: loop body
LE: loop exit
PB: predicated region body
PF: predicated region fallthrough
CT: control target
= control target key end

     0   :  { %s2313_s0 = inlined_call_operand.vmem [shape: s32[16,1], index: 0, kind: input, shape index: {}]   ;;  %s2314_s1 = inlined_call_operand.vmem [shape: s32[16,1], index: 1, kind: input, shape index: {}]   ;;  %s2315_s2 = inlined_call_operand.vmem [shape: f32[11,16], index: 2, kind: input, shape index: {}]   ;;  %s2316_s3 = inlined_call_operand.vmem [shape: f32[7,16], index: 3, kind: input, shape index: {}]   ;;  %s2317_s4 = inlined_call_operand.hbm [shape: f32[2,32,128], index: 4, kind: input, shape index: {}]   ;;  %s2318_s5 = inlined_call_operand.hbm [shape: f32[2,32,128], index: 5, kind: input, shape index: {}]   ;;  %s2319_s6 = inlined_call_operand.vmem [shape: f32[2,1,128], index: 6, kind: input, shape index: {}]   ;;  %s2320_s7 = inlined_call_operand.hbm [shape: f32[2,8,2,32], index: 7, kind: output, shape index: {0}]   ;;  %s2321_s8 = inlined_call_operand.hbm [shape: f32[2,2,32], index: 8, kind: output, shape index: {1}]   ;;  %s2322_s9 = inlined_call_operand.hbm [shape: f32[2,2,32], index: 9, kind: output, shape index: {2}]  }
   0x1   :  { %2335 = sst [smem:[#allocation22_spill]] %s2313_s0 }
   0x2   :  { %2336 = sst [smem:[#allocation23_spill]] %s2314_s1 }
   0x3   :  { %2337 = sst [smem:[#allocation24_spill]] %s2315_s2 }
   0x4   :  { %2338 = sst [smem:[#allocation25_spill]] %s2316_s3 }
   0x5   :  { %2339 = sst [smem:[#allocation26_spill]] %s2317_s4 }
   0x6   :  { %2340 = sst [smem:[#allocation27_spill]] %s2318_s5 }
   0x7   :  { %15 = vsyncpa [#allocation4], 0 }
   0x8   :  { %17 = vsyncpa [#allocation4 + $0x1], 0 }
   0x9   :  { %18 = vsyncpa [#allocation7], 0 }
   0xa   :  { %20 = vsyncpa [#allocation7 + $0x1], 0 }
   0xb   :  { %21 = vsyncpa [#allocation5], 0 }
   0xc   :  { %23 = vsyncpa [#allocation5 + $0x1], 0 }
   0xd   :  { %24 = vsyncpa [#allocation10], 0 }
   0xe   :  { %26 = vsyncpa [#allocation10 + $0x1], 0  ;;  %s1913_s30 = smov 0   ;;  %s1915_s10 = smov 0  }
   0xf   :  { %s1917_s11 = smov 0   ;;  %s1919_s12 = smov 0  }
  0x10 LB: > { %2341 = sst [smem:[#allocation16_spill]] %s1841_s30  ;;  %s1934_s13 = sadd.s32 4294967295, %s1853_s12   ;;  %s1853_s12 = sphi %s1919_s12, %s2375_s12   ;;  %s1849_s11 = sphi %s1917_s11, %s2377_s11   ;;  %s1845_s10 = sphi %s1915_s10, %s2379_s10   ;;  %s1841_s30 = sphi %s1913_s30, %s2378_s30  }
  0x11   : > { %2342 = sst [smem:[#allocation17_spill]] %s1849_s11  ;;  %s2323_s14 = sadd.s32 4294967294, %s1853_s12  }
  0x12   : > { %s1938_s15 = sadd.s32 1, %s1853_s12   ;;  %s123_s16 = sadd.s32 1, %s1849_s11 }
  0x13   : > { %2343 = sst [smem:[#allocation18_spill]] %s1938_s15  ;;  %s120_s17 = ssub.s32 %s1853_s12, %s1938_s15 }
  0x14   : > { %p130_p0 = scmp.ne.s32.totalorder %s1849_s11, %s1845_s10  ;;  %p121_p1 = scmp.eq.s32.totalorder %s120_s17, 0 }
  0x15   : > { %p131_p2 = scmp.eq.s32.totalorder %s1853_s12, 0  ;;  %p136_p3 = scmp.ne.s32.totalorder %s1845_s10, %s1841_s30 }
  0x16   : > { %p2326_p4 = scmp.eq.s32.totalorder %s1934_s13, 0  ;;  %p212_p7 = scmp.eq.s32.totalorder %s1934_s13, 1 }
  0x17   : > { %s1950_s18 = scalar_select %p121_p1, %s1849_s11, %s123_s16  }
  0x18   : > { %p1952_p5 = por %p131_p2, %p130_p0  ;;  %p1958_p6 = por %p2326_p4, %p136_p3 }
  0x19   : > { %2344 = sst [smem:[#allocation19_spill]] %s1950_s18  ;;  %p218_p8 = scmp.eq.s32.totalorder %s2323_s14, 1 }
  0x1a   : > { %p1554_p10 = scmp.lt.s32.totalorder %s1853_s12, 2  ;;  %p1967_p11 = por %p212_p7, %p130_p0 }
  0x1b   : > { %p1971_p12 = por %p218_p8, %p136_p3  ;;  %s1976_s23 = sand.u32 1, %s1849_s11  }
  0x1c   : > { %s2347_s21 = scalar_select %p1967_p11, 1, 0 }
  0x1d   : > { %s2349_s22 = scalar_select %p1971_p12, 1, 0 }
  0x1e   : > { %2348 = sst [smem:[#allocation20_spill]] %s2347_s21  ;;  %s2327_s24 = sshll.u32 %s1853_s12, 5 }
  0x1f   : > { %2350 = sst [smem:[#allocation21_spill]] %s2349_s22  ;;  %s2325_s25 = sshll.u32 %s1976_s23, 5 }
  0x20   : > { %s2351_s4 = sld [smem:[#allocation26_spill]]  ;;  %s306_s16 = scalar_lea.vmem [#allocation3], %s2325_s25 }
  0x21   : > { %s314_s17 = sshll.u32 %s306_s16, 4  ;;  %p1989_p13 = pnand %p1554_p10, %p1952_p5  ;;  %s315_s17 = int_to_ptr.vmem [resolvable:$true] %s314_s17 }
  0x22   : > { %p1473_p0 = scmp.ge.s32.totalorder %s1853_s12, 1  ;;  %p350_p1 = scmp.lt.s32.totalorder %s1853_s12, 3 }
  0x23   : > { %s303_s18 = scalar_lea.sflag [#allocation4], %s1976_s23  ;;  %p1667_p3 = pneg %p1989_p13 }
  0x26   : > { %s311_s28 = scalar_lea.hbm %s2351_s4, %s2327_s24 }
  0x27   : > { %s312_s29 = sshll.u32 %s311_s28, 4  ;;  %s1670_s28 = scalar_lea.hbm %s2351_s4, 64  ;;  %s313_s29 = int_to_ptr.hbm [resolvable:$true] %s312_s29 }
  0x28   : > { %s1663_s11 = sshra.s32 %s313_s29, 4  ;;  %s1664_s11 = int_to_ptr.hbm [resolvable:$true] %s1663_s11 }
  0x29   : > { %s1665_s26 = scalar_lea.hbm %s1664_s11, 32  ;;  %p1671_p5 = scmp.lt.s32.totalorder %s1664_s11, %s2351_s4 }
  0x2a   : > { %p1666_p2 = scmp.ne.s32.totalorder %s1664_s11, %s1665_s26  ;;  %p1672_p10 = scmp.lt.s32.totalorder %s1670_s28, %s1665_s26 }
  0x2c   : > { %p1668_p7 = pnand %p1667_p3, %p1666_p2  ;;  %p1673_p9 = por %p1672_p10, %p1671_p5 }
  0x2e   : > { %p1669_p8 = pneg %p1668_p7 }
  0x30   : > { %p1674_p4 = pnand %p1673_p9, %p1669_p8 }
  0x32   : > { %1677 = shalt.err (!%p1674_p4)
}
  0x33   : > { %s1855_s24 = smov 128   ;;  %s1856_s15 = smov 8  }
  0x34   : > { %1540 = dma.hbm_to_vmem [thread:$0]  (!%p1989_p13), %s313_s29, 512, %s315_s17, %s303_s18, %s1855_s24, %s1855_s24, %s1856_s15  }
  0x35   : > { %p2013_p2 = pnand %p1473_p0, %p350_p1  ;;  %s2354_s11 = sshll.u32 %s1853_s12, 5 }
  0x36   : > { %s2355_s5 = sld [smem:[#allocation27_spill]]  ;;  %s2356_s16 = sshll.u32 %s1976_s23, 5 }
  0x37   : > { %s328_s4 = scalar_lea.vmem [#allocation6], %s2356_s16  ;;  %s325_s30 = scalar_lea.sflag [#allocation7], %s1976_s23 }
  0x38   : > { %s336_s22 = sshll.u32 %s328_s4, 4  ;;  %s337_s22 = int_to_ptr.vmem [resolvable:$true] %s336_s22 }
  0x3c   : > { %s333_s27 = scalar_lea.hbm %s2355_s5, %s2354_s11  ;;  %s1700_s26 = scalar_lea.hbm %s2355_s5, 64 }
  0x3d   : > { %s334_s28 = sshll.u32 %s333_s27, 4  ;;  %s335_s28 = int_to_ptr.hbm [resolvable:$true] %s334_s28 }
  0x3e   : > { %s1693_s21 = sshra.s32 %s335_s28, 4  ;;  %s1694_s21 = int_to_ptr.hbm [resolvable:$true] %s1693_s21 }
  0x3f   : > { %s1695_s18 = scalar_lea.hbm %s1694_s21, 32  ;;  %p1701_p1 = scmp.lt.s32.totalorder %s1694_s21, %s2355_s5 }
  0x40   : > { %p1696_p4 = scmp.ne.s32.totalorder %s1694_s21, %s1695_s18  ;;  %p1702_p7 = scmp.lt.s32.totalorder %s1700_s26, %s1695_s18 }
  0x42   : > { %p1698_p9 = pnand %p1696_p4, %p1667_p3  ;;  %p1703_p8 = por %p1702_p7, %p1701_p1 }
  0x44   : > { %p1699_p0 = pneg %p1698_p9 }
  0x46   : > { %p1704_p5 = pnand %p1703_p8, %p1699_p0 }
  0x48   : > { %1707 = shalt.err (!%p1704_p5)
}
  0x49   : > { %1543 = dma.hbm_to_vmem [thread:$0]  (!%p1989_p13), %s335_s28, 512, %s337_s22, %s325_s30, %s1855_s24, %s1855_s24, %s1856_s15  }
  0x4a   : > { %354 = sbr.rel (%p2013_p2) target bundleno = 4871 (0x1307), region = 48  ;;  %s2039_s4 = sand.u32 (!%p2013_p2), 1, %s1845_s10  }
  0x4b   : > { %s1474_s23 = sshll.u32 (!%p2013_p2), %s2039_s4, 5  ;;  %s357_s27 = scalar_lea.sflag (!%p2013_p2), [#allocation4], %s2039_s4 }
  0x4c   : > { %s360_s16 = scalar_lea.vmem (!%p2013_p2), [#allocation3], %s1474_s23 }
  0x4f   : > { %1824 = dma.done.wait (%p1958_p6), %s357_s27, 512  }
  0x50   : > { %1826 = vsyncadd (%p1958_p6), %s357_s27, 4294966784  ;;  %s367_s30 = scalar_lea.sflag [#allocation7], %s2039_s4  ;;  %s2048_s14 = scalar_lea.vmem [#allocation6], %s1474_s23 }
  0x51   : > { %1828 = dma.done.wait (%p1958_p6), %s367_s30, 512  }
  0x52   : > { %1830 = vsyncadd (%p1958_p6), %s367_s30, 4294966784  ;;  %v1857_v0 = vmov 0   ;;  %v434_v1 = vld [vmem:[%s360_s16 + $0x8] sm:$0xff]  ;;  %v519_v2 = vld [vmem:[%s360_s16 + $0x18] sm:$0xff]  ;;  %s2357_s2 = sld [smem:[#allocation24_spill]]  ;;  %vm435_vm0 = vcmask 130048   ;;  %v465_v18 = vlaneseq }
  0x53   : > { %1596 = vset.pattern.permute.xlu0 %v1857_v0  ;;  %1597 = vset.pattern.permute.xlu1 %v1857_v0  ;;  %v433_v3 = vld [vmem:[%s360_s16] sm:$0xff]  ;;  %v518_v4 = vld [vmem:[%s360_s16 + $0x10] sm:$0xff]  ;;  %s2358_s3 = sld [smem:[#allocation25_spill]]  ;;  %p424_p6 = scmp.lt.s32.totalorder %s1934_s13, 1  ;;  %v616_v12 = vld [vmem:[%s2048_s14 + $0x18] sm:$0xff]  ;;  %v1858_v16 = vmov 0.0  }
  0x54   : > { %456 = vmatpush.msra.mxu0 %v434_v1  ;;  %537 = vmatpush.msra.mxu2 %v519_v2  ;;  %s2359_s1 = sld [smem:[#allocation23_spill]]  ;;  %v615_v13 = vld [vmem:[%s2048_s14 + $0x10] sm:$0xff]  ;;  %v614_v14 = vld [vmem:[%s2048_s14 + $0x8] sm:$0xff]  ;;  %v613_v15 = vld [vmem:[%s2048_s14] sm:$0xff]  ;;  %v466_v19 = vand.u32 127, %v465_v18  ;;  %vm564_vm2 = vcmask 1046528  }
  0x55   : > { %s2360_s0 = sld [smem:[#allocation22_spill]]  ;;  %vm557_vm3 = vcmask 56320   ;;  %vm488_vm4 = vcmask 1042432   ;;  %vm481_vm6 = vcmask 89088   ;;  %p2361_p13 = scmp.eq.s32.totalorder %s1934_s13, 0  ;;  %vm684_vm13 = vcmask 254976  }
  0x56   : > { %457 = vmatpush.msra.mxu0 %v433_v3  ;;  %538 = vmatpush.msra.mxu2 %v518_v4  ;;  %s2077_s27 = scalar_select %p424_p6, %s1934_s13, 1  ;;  %vm617_vm14 = vcmask 261120  }
  0x57   : > { %s2098_s22 = scalar_select %p2361_p13, 0, 7 }
  0x58   : > { %v431_v5 = vld [vmem:[%s2357_s2] sm:$0xff]  ;;  %v432_v9 = vld [vmem:[%s2357_s2 + $0x8] sm:$0x7]  ;;  %s426_s15 = scalar_lea.vmem %s2319_s6, %s2077_s27  ;;  %633 = vmatpush.msrb.mxu2 %v616_v12  ;;  %782 = vmatpush.msrb.mxu0 %v616_v12  ;;  %s1859_s25 = smov 64  }
  0x59   : > { %v517_v6 = vld [vmem:[%s2358_s3] sm:$0x7f]  ;;  %1479 = vmatmul.msk.f32.vlgmr.msra.gmra.mxu0 %vm435_vm0, %v431_v5  ;;  %s1492_s24 = sshll.u32 %s2098_s22, 1  ;;  %s2334_s28 = smov 32  }
  0x5a   : > { %v543_v7 = vld [vmem:[%s2359_s1] sm:$0xff]  ;;  %v544_v8 = vld [vmem:[%s2359_s1 + $0x8] sm:$0xff]  ;;  %1486 = vmatmul.msk.f32.vlgmr.msra.gmra.mxu2 %vm435_vm0, %v517_v6  ;;  %783 = vmatpush.msrb.mxu0 %v615_v13  ;;  %s611_s20 = scalar_lea.vmem [#allocation2], %s1492_s24  ;;  %s1476_s18 = sshll.u32 %s2039_s4, 4 }
  0x5b   : > { %546 = vperm.xlu0 %1596, %v543_v7   ;;  %549 = vperm.xlu1 %1597, %v544_v8   ;;  %v467_v10 = vld [vmem:[%s2360_s0] sm:$0xff]  ;;  %v468_v11 = vld [vmem:[%s2360_s0 + $0x8] sm:$0xff]  ;;  %s2108_s29 = scalar_lea.vmem [#allocation8], %s1476_s18  ;;  %p2362_p3 = pmov %p2361_p13 }
  0x5c   : > { %634 = vmatpush.msrb.mxu2 %v615_v13  ;;  %784 = vmatpush.msrb.mxu0 %v614_v14  ;;  %v1598_v30 = vld [vmem:[%s426_s15] ss:$0 sm:$0xff]  ;;  %s683_s17 = scalar_lea.vmem %s2108_s29, %s1492_s24 [#allocation8]  ;;  %s1233_s5 = sshll.u32 %s2108_s29, 4  ;;  %s2240_s5 = int_to_ptr.vmem [resolvable:$true] %s1233_s5 }
  0x5d   : > { %s2117_s26 = scalar_select %p2362_p3, 1, 6 }
  0x5e   : > { %635 = vmatpush.msrb.mxu2 %v614_v14  ;;  %785 = vmatpush.msrb.mxu0 %v613_v15  ;;  %p2363_p10 = pmov %p2362_p3  ;;  %p2364_p2 = pmov %p2362_p3 }
  0x5f   : > { %s1494_s11 = sshll.u32 %s2117_s26, 1 }
  0x60   : > { %636 = vmatpush.msrb.mxu2 %v613_v15  ;;  %1078 = vmatpush.msra.mxu0 %v616_v12  ;;  %s688_s19 = scalar_lea.vmem [#allocation2], %s1494_s11  ;;  %s758_s23 = scalar_lea.vmem %s2108_s29, %s1494_s11 [#allocation8] }
  0x61   : > { %1480 = vmatmul.msk.f32.gmra.mxu0 %vm435_vm0, %v432_v9  ;;  %s2133_s27 = scalar_select %p2363_p10, 2, 5 }
  0x62   : > { %637 = vmatmul.f32.vlgmr.msrb.gmra.mxu2 %v1858_v16  ;;  %1079 = vmatpush.msra.mxu0 %v615_v13  ;;  %s2149_s14 = scalar_select %p2364_p2, 3, 4 }
  0x63   : > { %470 = vperm.xlu0 %1596, %v467_v10   ;;  %473 = vperm.xlu1 %1597, %v468_v11   ;;  %s1497_s16 = sshll.u32 %s2133_s27, 1  ;;  %p2365_p4 = pmov %p2364_p2 }
  0x64   : > { %930 = vmatpush.msra.mxu2 %v616_v12  ;;  %1080 = vmatpush.msra.mxu0 %v614_v14  ;;  %s762_s30 = scalar_lea.vmem [#allocation2], %s1497_s16  ;;  %s832_s15 = scalar_lea.vmem %s2108_s29, %s1497_s16 [#allocation8] }
  0x65   : > { %s1500_s21 = sshll.u32 %s2149_s14, 1  ;;  %p2366_p9 = pmov %p2364_p2 }
  0x66   : > { %931 = vmatpush.msra.mxu2 %v615_v13  ;;  %1081 = vmatpush.msra.mxu0 %v613_v15  ;;  %s836_s22 = scalar_lea.vmem [#allocation2], %s1500_s21  ;;  %s906_s24 = scalar_lea.vmem %s2108_s29, %s1500_s21 [#allocation8] }
  0x67   : > { %s2181_s11 = scalar_select %p2366_p9, 5, 2 }
  0x68   : > { %932 = vmatpush.msra.mxu2 %v614_v14  ;;  %p2367_p0 = pmov %p2364_p2 }
  0x6a   : > { %933 = vmatpush.msra.mxu2 %v613_v15  ;;  %s2197_s16 = scalar_select %p2367_p0, 6, 1 }
  0x6b   : > { %p2368_p1 = pmov %p2367_p0 }
  0x6d   : > { %s2213_s21 = scalar_select %p2368_p1, 7, 0 }
  0xcd   : > { %v547_v17 = vpop.permute.xlu0 %546  ;;  %v550_v21 = vpop.permute.xlu1 %549 }
  0xce   : > { %vm551_vm1 = vcmp.eq.s32.totalorder %v547_v17, %v466_v19  ;;  %vm552_vm7 = vcmp.eq.s32.totalorder %v550_v21, %v466_v19 }
  0xcf   : > { %v1487_v24 = vsel %vm551_vm1, 1.0, %v1858_v16  ;;  %v1488_v28 = vsel %vm552_vm7, 1.0, %v1858_v16 }
  0xd5   : > { %v471_v22 = vpop.permute.xlu0 %470  ;;  %v474_v27 = vpop.permute.xlu1 %473 }
  0xd6   : > { %v459_v20 = vpop.f32.mrf.mxu0  ;;  %vm475_vm5 = vcmp.eq.s32.totalorder %v471_v22, %v466_v19  ;;  %vm476_vm8 = vcmp.eq.s32.totalorder %v474_v27, %v466_v19 }
  0xd7   : > { %v1481_v26 = vsel %vm475_vm5, 1.0, %v1858_v16  ;;  %v1482_v29 = vsel %vm476_vm8, 1.0, %v1858_v16 }
  0xdd   : > { %v540_v23 = vpop.f32.mrf.mxu2 }
  0xde   : > { %1489 = vmatpush.msk.msra.mxu3 %vm564_vm2, %v540_v23  ;;  %v462_v25 = vpop.f32.mrf.mxu0 }
  0xdf   : > { %1490 = vmatmul.msk.f32.vlgmr.msra.gmra.mxu3 %vm557_vm3, %v1487_v24  ;;  %1483 = vmatpush.msk.msra.mxu1 %vm488_vm4, %v462_v25 }
  0xe0   : > { %708 = vmatpush.msrb.mxu3 %v616_v12 }
  0xe1   : > { %507 = vmatpush.msra.mxu1 %v459_v20 }
  0xe2   : > { %709 = vmatpush.msrb.mxu3 %v615_v13  ;;  %1484 = vmatmul.msk.f32.vlgmr.msra.gmra.mxu1 %vm481_vm6, %v1481_v26 }
  0xe3   : > { %856 = vmatpush.msrb.mxu1 %v616_v12 }
  0xe4   : > { %710 = vmatpush.msrb.mxu3 %v614_v14 }
  0xe5   : > { %857 = vmatpush.msrb.mxu1 %v615_v13  ;;  %v638_v39 = vpop.f32.mrf.mxu2 }
  0xe6   : > { %711 = vmatpush.msrb.mxu3 %v613_v15 }
  0xe7   : > { %1491 = vmatmul.msk.f32.gmra.mxu3 %vm557_vm3, %v1488_v28  ;;  %858 = vmatpush.msrb.mxu1 %v614_v14 }
  0xe8   : > { %1004 = vmatpush.msra.mxu3 %v616_v12 }
  0xe9   : > { %859 = vmatpush.msrb.mxu1 %v613_v15 }
  0xea   : > { %1005 = vmatpush.msra.mxu3 %v615_v13  ;;  %1485 = vmatmul.msk.f32.gmra.mxu1 %vm481_vm6, %v1482_v29 }
  0xeb   : > { %1152 = vmatpush.msra.mxu1 %v616_v12 }
  0xec   : > { %1006 = vmatpush.msra.mxu3 %v614_v14 }
  0xed   : > { %1153 = vmatpush.msra.mxu1 %v615_v13 }
  0xee   : > { %1007 = vmatpush.msra.mxu3 %v613_v15 }
  0xef   : > { %1154 = vmatpush.msra.mxu1 %v614_v14 }
  0xf1   : > { %1155 = vmatpush.msra.mxu1 %v613_v15 }
 0x15f   : > { %v509_v31 = vpop.f32.mrf.mxu1 }
 0x160   : > { %v515_v32 = vadd.f32 %v1598_v30, %v509_v31 }
 0x162   : > { %v585_v33 = vpop.f32.mrf.mxu3 }
 0x163   : > { %v591_v34 = vadd.f32 %v585_v33, %v515_v32 }
 0x165   : > { %593 = vst [vmem:[#allocation2] sm:$0xf] %v591_v34  }
 0x166   : > { %597 = vst [vmem:[#allocation2] sm:$0xf0] %v591_v34  }
 0x167   : > { %v512_v35 = vpop.f32.mrf.mxu1 }
 0x168   : > { %v516_v36 = vadd.f32 %v1598_v30, %v512_v35 }
 0x16a   : > { %v588_v37 = vpop.f32.mrf.mxu3 }
 0x16b   : > { %v592_v38 = vadd.f32 %v588_v37, %v516_v36 }
 0x16d   : > { %601 = vst [vmem:[#allocation2 + $0x8] sm:$0xf] %v592_v38  }
 0x16e   : > { %605 = vst [vmem:[#allocation2 + $0x8] sm:$0xf0] %v592_v38  }
 0x175   : > { %v612_v40 = vld [vmem:[%s611_s20] sm:$0x3]  ;;  %s2165_s20 = scalar_select %p2365_p4, 4, 3 }
 0x176   : > { %v641_v41 = vadd.f32 %v638_v39, %v612_v40  ;;  %v689_v1 = vld [vmem:[%s688_s19] sm:$0x3]  ;;  %s1506_s19 = sshll.u32 %s2181_s11, 1  ;;  %s1526_s11 = sshll.u32 %s1934_s13, 4 }
 0x177   : > { %v763_v27 = vld [vmem:[%s762_s30] sm:$0x3]  ;;  %s1503_s18 = sshll.u32 %s2165_s20, 1  ;;  %s1054_s27 = scalar_lea.vmem %s2108_s29, %s1506_s19 [#allocation8] }
 0x178   : > { %1599 = vtanh.f32 %v641_v41  ;;  %v1493_v43 = vmul.f32 -1.442695, %v641_v41  ;;  %s980_s26 = scalar_lea.vmem %s2108_s29, %s1503_s18 [#allocation8]  ;;  %s1509_s30 = sshll.u32 %s2197_s16, 1 }
 0x179   : > { %s1128_s14 = scalar_lea.vmem %s2108_s29, %s1509_s30 [#allocation8]  ;;  %s1861_s20 = smov 96  }
 0x17a   : > { %1601 = vpow2.f32 %v1493_v43  ;;  %s1232_s0 = scalar_lea.hbm %s2320_s7, %s1526_s11 }
 0x17e   : > { %v1600_v42 = vpop.eup %1599 }
 0x17f   : > { %664 = vrot.lane.b32.xlu2 %v1600_v42, %s1859_s25 }
 0x180   : > { %v1602_v44 = vpop.eup %1601 }
 0x181   : > { %v645_v45 = vadd.f32 1.0, %v1602_v44 }
 0x183   : > { %1603 = vrcp.f32 %v645_v45  ;;  %v657_v51 = vand.u32 2147483648, %v645_v45  ;;  %vm651_vm10 = vweird.f32 %v645_v45  ;;  %v655_v52 = vand.u32 2147483647, %v645_v45 }
 0x185   : > { %v658_v54 = vor.u32 1.1754944e-38, %v657_v51  ;;  %vm656_vm12 = vcmp.eq.f32.partialorder %v655_v52, 8.507059e+37 }
 0x189   : > { %v1604_v46 = vpop.eup %1603 }
 0x18a   : > { %v647_v47 = vmul.f32 %v1604_v46, %v645_v45  ;;  %vm652_vm9 = vweird.f32 %v1604_v46 }
 0x18b   : > { %vm653_vm11 = vmor %vm651_vm10, %vm652_vm9 }
 0x18c   : > { %v648_v48 = vsub.f32 1.0, %v647_v47 }
 0x18e   : > { %v649_v49 = vmul.f32 %v1604_v46, %v648_v48 }
 0x190   : > { %v650_v50 = vadd.f32 %v1604_v46, %v649_v49 }
 0x192   : > { %v654_v53 = vsel %vm653_vm11, %v1604_v46, %v650_v50 }
 0x193   : > { %v659_v56 = vsel %vm656_vm12, %v658_v54, %v654_v53  ;;  %v837_v53 = vld [vmem:[%s836_s22] sm:$0x3]  ;;  %s1512_s22 = sshll.u32 %s2213_s21, 1 }
 0x194   : > { %v662_v58 = vmul.f32 0.0, %v659_v56 }
 0x1d9   : > { %v665_v55 = vpop.permute.xlu2 %664 }
 0x1da   : > { %v667_v57 = vmul.f32 %v665_v55, %v659_v56 }
 0x1dc   : > { %669 = vrot.lane.b32.xlu2 %v667_v57, %s2334_s28 }
 0x236   : > { %v670_v59 = vpop.permute.xlu2 %669 }
 0x237   : > { %v672_v60 = vadd.f32 %v670_v59, %v662_v58 }
 0x239   : > { %1605 = vtanh.f32 %v672_v60 }
 0x23f   : > { %v1606_v61 = vpop.eup %1605 }
 0x240   : > { %675 = vrot.lane.b32.xlu0 %v1606_v61, %s1859_s25 }
 0x2b2   : > { %v676_v62 = vpop.permute.xlu0 %675 }
 0x2b3   : > { %v678_v63 = vmul.f32 %v676_v62, %v659_v56 }
 0x2b5   : > { %680 = vrot.lane.b32.xlu1 %v678_v63, %s2334_s28 }
 0x327   : > { %v681_v0 = vpop.permute.xlu1 %680 }
 0x328   : > { %685 = vst.msk [vmem:[%s683_s17] sm:$0x3] %vm684_vm13, %v681_v0  ;;  %1495 = vmatmul.msk.f32.vlgmr.msrb.gmra.mxu3 %vm617_vm14, %v681_v0  ;;  %s910_s17 = scalar_lea.vmem [#allocation2], %s1503_s18  ;;  %s1477_s18 = sshll.u32 %s2039_s4, 1 }
 0x3ab   : > { %v713_v2 = vpop.f32.mrf.mxu3 }
 0x3ac   : > { %v716_v3 = vadd.f32 %v713_v2, %v689_v1 }
 0x3ae   : > { %1607 = vtanh.f32 %v716_v3  ;;  %v1496_v5 = vmul.f32 -1.442695, %v716_v3 }
 0x3b0   : > { %1609 = vpow2.f32 %v1496_v5 }
 0x3b4   : > { %v1608_v4 = vpop.eup %1607 }
 0x3b5   : > { %739 = vrot.lane.b32.xlu2 %v1608_v4, %s1859_s25 }
 0x3b6   : > { %v1610_v6 = vpop.eup %1609 }
 0x3b7   : > { %v720_v7 = vadd.f32 1.0, %v1610_v6 }
 0x3b9   : > { %1611 = vrcp.f32 %v720_v7  ;;  %v732_v13 = vand.u32 2147483648, %v720_v7  ;;  %vm726_vm0 = vweird.f32 %v720_v7  ;;  %v730_v14 = vand.u32 2147483647, %v720_v7 }
 0x3bb   : > { %v733_v16 = vor.u32 1.1754944e-38, %v732_v13  ;;  %vm731_vm2 = vcmp.eq.f32.partialorder %v730_v14, 8.507059e+37 }
 0x3bf   : > { %v1612_v8 = vpop.eup %1611 }
 0x3c0   : > { %v722_v9 = vmul.f32 %v1612_v8, %v720_v7  ;;  %vm727_vm15 = vweird.f32 %v1612_v8 }
 0x3c1   : > { %vm728_vm1 = vmor %vm726_vm0, %vm727_vm15 }
 0x3c2   : > { %v723_v10 = vsub.f32 1.0, %v722_v9 }
 0x3c4   : > { %v724_v11 = vmul.f32 %v1612_v8, %v723_v10 }
 0x3c6   : > { %v725_v12 = vadd.f32 %v1612_v8, %v724_v11 }
 0x3c8   : > { %v729_v15 = vsel %vm728_vm1, %v1612_v8, %v725_v12 }
 0x3c9   : > { %v734_v18 = vsel %vm731_vm2, %v733_v16, %v729_v15  ;;  %v911_v15 = vld [vmem:[%s910_s17] sm:$0x3]  ;;  %s423_s17 = scalar_lea.vmem [#allocation11], %s1477_s18 }
 0x3ca   : > { %v737_v20 = vmul.f32 %v734_v18, %v672_v60 }
 0x40f   : > { %v740_v17 = vpop.permute.xlu2 %739 }
 0x410   : > { %v742_v19 = vmul.f32 %v740_v17, %v734_v18 }
 0x412   : > { %744 = vrot.lane.b32.xlu0 %v742_v19, %s2334_s28 }
 0x484   : > { %v745_v21 = vpop.permute.xlu0 %744 }
 0x485   : > { %v747_v22 = vadd.f32 %v745_v21, %v737_v20 }
 0x487   : > { %1613 = vtanh.f32 %v747_v22 }
 0x48d   : > { %v1614_v23 = vpop.eup %1613 }
 0x48e   : > { %750 = vrot.lane.b32.xlu1 %v1614_v23, %s1859_s25 }
 0x500   : > { %v751_v24 = vpop.permute.xlu1 %750 }
 0x501   : > { %v753_v25 = vmul.f32 %v751_v24, %v734_v18 }
 0x503   : > { %755 = vrot.lane.b32.xlu2 %v753_v25, %s2334_s28 }
 0x55d   : > { %v756_v26 = vpop.permute.xlu2 %755 }
 0x55e   : > { %759 = vst.msk [vmem:[%s758_s23] sm:$0x3] %vm684_vm13, %v756_v26  ;;  %1498 = vmatmul.msk.f32.vlgmr.msrb.gmra.mxu0 %vm617_vm14, %v756_v26  ;;  %s984_s23 = scalar_lea.vmem [#allocation2], %s1506_s19  ;;  %s1202_s19 = scalar_lea.vmem %s2108_s29, %s1512_s22 [#allocation8] }
 0x55f   : > { %s1743_s29 = scalar_lea.hbm %s2321_s8, 4 }
 0x5db   : > { %v787_v28 = vpop.f32.mrf.mxu0 }
 0x5dc   : > { %v790_v29 = vadd.f32 %v787_v28, %v763_v27 }
 0x5de   : > { %1615 = vtanh.f32 %v790_v29  ;;  %v1499_v31 = vmul.f32 -1.442695, %v790_v29 }
 0x5e0   : > { %1617 = vpow2.f32 %v1499_v31 }
 0x5e4   : > { %v1616_v30 = vpop.eup %1615 }
 0x5e5   : > { %813 = vrot.lane.b32.xlu0 %v1616_v30, %s1859_s25 }
 0x5e6   : > { %v1618_v32 = vpop.eup %1617 }
 0x5e7   : > { %v794_v33 = vadd.f32 1.0, %v1618_v32 }
 0x5e9   : > { %1619 = vrcp.f32 %v794_v33  ;;  %v806_v39 = vand.u32 2147483648, %v794_v33  ;;  %vm800_vm4 = vweird.f32 %v794_v33  ;;  %v804_v40 = vand.u32 2147483647, %v794_v33 }
 0x5eb   : > { %v807_v42 = vor.u32 1.1754944e-38, %v806_v39  ;;  %vm805_vm6 = vcmp.eq.f32.partialorder %v804_v40, 8.507059e+37 }
 0x5ef   : > { %v1620_v34 = vpop.eup %1619 }
 0x5f0   : > { %v796_v35 = vmul.f32 %v1620_v34, %v794_v33  ;;  %vm801_vm3 = vweird.f32 %v1620_v34 }
 0x5f1   : > { %vm802_vm5 = vmor %vm800_vm4, %vm801_vm3 }
 0x5f2   : > { %v797_v36 = vsub.f32 1.0, %v796_v35 }
 0x5f4   : > { %v798_v37 = vmul.f32 %v1620_v34, %v797_v36 }
 0x5f6   : > { %v799_v38 = vadd.f32 %v1620_v34, %v798_v37 }
 0x5f8   : > { %v803_v41 = vsel %vm802_vm5, %v1620_v34, %v799_v38 }
 0x5f9   : > { %v808_v44 = vsel %vm805_vm6, %v807_v42, %v803_v41  ;;  %v985_v41 = vld [vmem:[%s984_s23] sm:$0x3] }
 0x5fa   : > { %v811_v46 = vmul.f32 %v808_v44, %v747_v22 }
 0x657   : > { %v814_v43 = vpop.permute.xlu0 %813 }
 0x658   : > { %v816_v45 = vmul.f32 %v814_v43, %v808_v44 }
 0x65a   : > { %818 = vrot.lane.b32.xlu1 %v816_v45, %s2334_s28 }
 0x6cc   : > { %v819_v47 = vpop.permute.xlu1 %818 }
 0x6cd   : > { %v821_v48 = vadd.f32 %v819_v47, %v811_v46 }
 0x6cf   : > { %1621 = vtanh.f32 %v821_v48 }
 0x6d5   : > { %v1622_v49 = vpop.eup %1621 }
 0x6d6   : > { %824 = vrot.lane.b32.xlu2 %v1622_v49, %s1859_s25 }
 0x730   : > { %v825_v50 = vpop.permute.xlu2 %824 }
 0x731   : > { %v827_v51 = vmul.f32 %v825_v50, %v808_v44 }
 0x733   : > { %829 = vrot.lane.b32.xlu0 %v827_v51, %s2334_s28 }
 0x7a5   : > { %v830_v52 = vpop.permute.xlu0 %829 }
 0x7a6   : > { %833 = vst.msk [vmem:[%s832_s15] sm:$0x3] %vm684_vm13, %v830_v52  ;;  %1501 = vmatmul.msk.f32.vlgmr.msrb.gmra.mxu1 %vm617_vm14, %v830_v52  ;;  %s1058_s15 = scalar_lea.vmem [#allocation2], %s1509_s30  ;;  %s1264_s30 = sshll.u32 %s423_s17, 4  ;;  %s2246_s30 = int_to_ptr.vmem [resolvable:$true] %s1264_s30 }
 0x823   : > { %v861_v54 = vpop.f32.mrf.mxu1 }
 0x824   : > { %v864_v55 = vadd.f32 %v861_v54, %v837_v53 }
 0x826   : > { %1623 = vtanh.f32 %v864_v55  ;;  %v1502_v57 = vmul.f32 -1.442695, %v864_v55 }
 0x828   : > { %1625 = vpow2.f32 %v1502_v57 }
 0x82c   : > { %v1624_v56 = vpop.eup %1623 }
 0x82d   : > { %887 = vrot.lane.b32.xlu1 %v1624_v56, %s1859_s25 }
 0x82e   : > { %v1626_v58 = vpop.eup %1625 }
 0x82f   : > { %v868_v59 = vadd.f32 1.0, %v1626_v58 }
 0x831   : > { %1627 = vrcp.f32 %v868_v59  ;;  %v880_v1 = vand.u32 2147483648, %v868_v59  ;;  %vm874_vm8 = vweird.f32 %v868_v59  ;;  %v878_v2 = vand.u32 2147483647, %v868_v59 }
 0x833   : > { %v881_v4 = vor.u32 1.1754944e-38, %v880_v1  ;;  %vm879_vm10 = vcmp.eq.f32.partialorder %v878_v2, 8.507059e+37 }
 0x837   : > { %v1628_v60 = vpop.eup %1627 }
 0x838   : > { %v870_v61 = vmul.f32 %v1628_v60, %v868_v59  ;;  %vm875_vm7 = vweird.f32 %v1628_v60 }
 0x839   : > { %vm876_vm9 = vmor %vm874_vm8, %vm875_vm7 }
 0x83a   : > { %v871_v62 = vsub.f32 1.0, %v870_v61 }
 0x83c   : > { %v872_v63 = vmul.f32 %v1628_v60, %v871_v62 }
 0x83e   : > { %v873_v0 = vadd.f32 %v1628_v60, %v872_v63 }
 0x840   : > { %v877_v3 = vsel %vm876_vm9, %v1628_v60, %v873_v0 }
 0x841   : > { %v882_v6 = vsel %vm879_vm10, %v881_v4, %v877_v3  ;;  %v1059_v3 = vld [vmem:[%s1058_s15] sm:$0x3]  ;;  %s416_s15 = scalar_lea.vmem [#allocation9], %s1477_s18 }
 0x842   : > { %v885_v8 = vmul.f32 %v882_v6, %v821_v48 }
 0x89f   : > { %v888_v5 = vpop.permute.xlu1 %887 }
 0x8a0   : > { %v890_v7 = vmul.f32 %v888_v5, %v882_v6 }
 0x8a2   : > { %892 = vrot.lane.b32.xlu2 %v890_v7, %s2334_s28 }
 0x8fc   : > { %v893_v9 = vpop.permute.xlu2 %892 }
 0x8fd   : > { %v895_v10 = vadd.f32 %v893_v9, %v885_v8 }
 0x8ff   : > { %1629 = vtanh.f32 %v895_v10 }
 0x905   : > { %v1630_v11 = vpop.eup %1629 }
 0x906   : > { %898 = vrot.lane.b32.xlu0 %v1630_v11, %s1859_s25 }
 0x978   : > { %v899_v12 = vpop.permute.xlu0 %898 }
 0x979   : > { %v901_v13 = vmul.f32 %v899_v12, %v882_v6 }
 0x97b   : > { %903 = vrot.lane.b32.xlu1 %v901_v13, %s2334_s28 }
 0x9ed   : > { %v904_v14 = vpop.permute.xlu1 %903 }
 0x9ee   : > { %907 = vst.msk [vmem:[%s906_s24] sm:$0x3] %vm684_vm13, %v904_v14  ;;  %1504 = vmatmul.msk.f32.vlgmr.msra.gmra.mxu2 %vm617_vm14, %v904_v14  ;;  %s1132_s24 = scalar_lea.vmem [#allocation2], %s1512_s22  ;;  %s1235_s22 = sshll.u32 %s1232_s0, 4  ;;  %s2243_s22 = int_to_ptr.hbm [resolvable:$true] %s1235_s22 }
 0xa71   : > { %v935_v16 = vpop.f32.mrf.mxu2 }
 0xa72   : > { %v938_v17 = vadd.f32 %v935_v16, %v911_v15 }
 0xa74   : > { %1631 = vtanh.f32 %v938_v17  ;;  %v1505_v19 = vmul.f32 -1.442695, %v938_v17 }
 0xa76   : > { %1633 = vpow2.f32 %v1505_v19 }
 0xa7a   : > { %v1632_v18 = vpop.eup %1631 }
 0xa7b   : > { %961 = vrot.lane.b32.xlu2 %v1632_v18, %s1859_s25 }
 0xa7c   : > { %v1634_v20 = vpop.eup %1633 }
 0xa7d   : > { %v942_v21 = vadd.f32 1.0, %v1634_v20 }
 0xa7f   : > { %1635 = vrcp.f32 %v942_v21  ;;  %v954_v27 = vand.u32 2147483648, %v942_v21  ;;  %vm948_vm12 = vweird.f32 %v942_v21  ;;  %v952_v28 = vand.u32 2147483647, %v942_v21 }
 0xa81   : > { %v955_v30 = vor.u32 1.1754944e-38, %v954_v27  ;;  %vm953_vm0 = vcmp.eq.f32.partialorder %v952_v28, 8.507059e+37 }
 0xa85   : > { %v1636_v22 = vpop.eup %1635 }
 0xa86   : > { %v944_v23 = vmul.f32 %v1636_v22, %v942_v21  ;;  %vm949_vm11 = vweird.f32 %v1636_v22 }
 0xa87   : > { %vm950_vm15 = vmor %vm948_vm12, %vm949_vm11 }
 0xa88   : > { %v945_v24 = vsub.f32 1.0, %v944_v23 }
 0xa8a   : > { %v946_v25 = vmul.f32 %v1636_v22, %v945_v24 }
 0xa8c   : > { %v947_v26 = vadd.f32 %v1636_v22, %v946_v25 }
 0xa8e   : > { %v951_v29 = vsel %vm950_vm15, %v1636_v22, %v947_v26 }
 0xa8f   : > { %v956_v32 = vsel %vm953_vm0, %v955_v30, %v951_v29  ;;  %v1133_v29 = vld [vmem:[%s1132_s24] sm:$0x3] }
 0xa90   : > { %v959_v34 = vmul.f32 %v956_v32, %v895_v10 }
 0xad5   : > { %v962_v31 = vpop.permute.xlu2 %961 }
 0xad6   : > { %v964_v33 = vmul.f32 %v962_v31, %v956_v32 }
 0xad8   : > { %966 = vrot.lane.b32.xlu0 %v964_v33, %s2334_s28 }
 0xb4a   : > { %v967_v35 = vpop.permute.xlu0 %966 }
 0xb4b   : > { %v969_v36 = vadd.f32 %v967_v35, %v959_v34 }
 0xb4d   : > { %1637 = vtanh.f32 %v969_v36 }
 0xb53   : > { %v1638_v37 = vpop.eup %1637 }
 0xb54   : > { %972 = vrot.lane.b32.xlu1 %v1638_v37, %s1859_s25 }
 0xbc6   : > { %v973_v38 = vpop.permute.xlu1 %972 }
 0xbc7   : > { %v975_v39 = vmul.f32 %v973_v38, %v956_v32 }
 0xbc9   : > { %977 = vrot.lane.b32.xlu2 %v975_v39, %s2334_s28 }
 0xc23   : > { %v978_v40 = vpop.permute.xlu2 %977 }
 0xc24   : > { %981 = vst.msk [vmem:[%s980_s26] sm:$0x3] %vm684_vm13, %v978_v40  ;;  %1507 = vmatmul.msk.f32.vlgmr.msra.gmra.mxu3 %vm617_vm14, %v978_v40  ;;  %s1520_s26 = sshll.u32 %s1934_s13, 1 }
 0xc25   : > { %s1248_s16 = scalar_lea.hbm %s2321_s8, %s1520_s26 }
 0xc26   : > { %s1252_s1 = sshll.u32 %s1248_s16, 4  ;;  %s1253_s1 = int_to_ptr.hbm [resolvable:$true] %s1252_s1 }
 0xc27   : > { %s1737_s3 = sshra.s32 %s1253_s1, 4  ;;  %s1738_s3 = int_to_ptr.hbm [resolvable:$true] %s1737_s3 }
 0xc28   : > { %s1739_s0 = scalar_lea.hbm %s1738_s3, 2  ;;  %p1744_p6 = scmp.lt.s32.totalorder %s1738_s3, %s2321_s8 }
 0xc29   : > { %p1740_p7 = scmp.ne.s32.totalorder %s1738_s3, %s1739_s0  ;;  %p1745_p13 = scmp.lt.s32.totalorder %s1743_s29, %s1739_s0 }
 0xc2b   : > { %p1741_p8 = pnand %p1740_p7, %p1967_p11  ;;  %p1746_p3 = por %p1745_p13, %p1744_p6 }
 0xc2d   : > { %p1742_p5 = pneg %p1741_p8 }
 0xc2f   : > { %p1747_p10 = pnand %p1746_p3, %p1742_p5 }
 0xca7   : > { %v1009_v42 = vpop.f32.mrf.mxu3 }
 0xca8   : > { %v1012_v43 = vadd.f32 %v1009_v42, %v985_v41 }
 0xcaa   : > { %1639 = vtanh.f32 %v1012_v43  ;;  %v1508_v45 = vmul.f32 -1.442695, %v1012_v43 }
 0xcac   : > { %1641 = vpow2.f32 %v1508_v45 }
 0xcb0   : > { %v1640_v44 = vpop.eup %1639 }
 0xcb1   : > { %1035 = vrot.lane.b32.xlu0 %v1640_v44, %s1859_s25 }
 0xcb2   : > { %v1642_v46 = vpop.eup %1641 }
 0xcb3   : > { %v1016_v47 = vadd.f32 1.0, %v1642_v46 }
 0xcb5   : > { %1643 = vrcp.f32 %v1016_v47  ;;  %v1028_v53 = vand.u32 2147483648, %v1016_v47  ;;  %vm1022_vm2 = vweird.f32 %v1016_v47  ;;  %v1026_v54 = vand.u32 2147483647, %v1016_v47 }
 0xcb7   : > { %v1029_v56 = vor.u32 1.1754944e-38, %v1028_v53  ;;  %vm1027_vm4 = vcmp.eq.f32.partialorder %v1026_v54, 8.507059e+37 }
 0xcbb   : > { %v1644_v48 = vpop.eup %1643 }
 0xcbc   : > { %v1018_v49 = vmul.f32 %v1644_v48, %v1016_v47  ;;  %vm1023_vm1 = vweird.f32 %v1644_v48 }
 0xcbd   : > { %vm1024_vm3 = vmor %vm1022_vm2, %vm1023_vm1 }
 0xcbe   : > { %v1019_v50 = vsub.f32 1.0, %v1018_v49 }
 0xcc0   : > { %v1020_v51 = vmul.f32 %v1644_v48, %v1019_v50 }
 0xcc2   : > { %v1021_v52 = vadd.f32 %v1644_v48, %v1020_v51 }
 0xcc4   : > { %v1025_v55 = vsel %vm1024_vm3, %v1644_v48, %v1021_v52 }
 0xcc5   : > { %v1030_v58 = vsel %vm1027_vm4, %v1029_v56, %v1025_v55 }
 0xcc6   : > { %v1033_v60 = vmul.f32 %v1030_v58, %v969_v36 }
 0xd23   : > { %v1036_v57 = vpop.permute.xlu0 %1035 }
 0xd24   : > { %v1038_v59 = vmul.f32 %v1036_v57, %v1030_v58 }
 0xd26   : > { %1040 = vrot.lane.b32.xlu1 %v1038_v59, %s2334_s28 }
 0xd98   : > { %v1041_v61 = vpop.permute.xlu1 %1040 }
 0xd99   : > { %v1043_v62 = vadd.f32 %v1041_v61, %v1033_v60 }
 0xd9b   : > { %1645 = vtanh.f32 %v1043_v62 }
 0xda1   : > { %v1646_v63 = vpop.eup %1645 }
 0xda2   : > { %1046 = vrot.lane.b32.xlu2 %v1646_v63, %s1859_s25 }
 0xdfc   : > { %v1047_v0 = vpop.permute.xlu2 %1046 }
 0xdfd   : > { %v1049_v1 = vmul.f32 %v1047_v0, %v1030_v58 }
 0xdff   : > { %1051 = vrot.lane.b32.xlu0 %v1049_v1, %s2334_s28 }
 0xe71   : > { %v1052_v2 = vpop.permute.xlu0 %1051 }
 0xe72   : > { %1055 = vst.msk [vmem:[%s1054_s27] sm:$0x3] %vm684_vm13, %v1052_v2  ;;  %1510 = vmatmul.msk.f32.vlgmr.msra.gmra.mxu0 %vm617_vm14, %v1052_v2 }
 0xeef   : > { %v1083_v4 = vpop.f32.mrf.mxu0 }
 0xef0   : > { %v1086_v5 = vadd.f32 %v1083_v4, %v1059_v3 }
 0xef2   : > { %1647 = vtanh.f32 %v1086_v5  ;;  %v1511_v7 = vmul.f32 -1.442695, %v1086_v5 }
 0xef4   : > { %1649 = vpow2.f32 %v1511_v7 }
 0xef8   : > { %v1648_v6 = vpop.eup %1647 }
 0xef9   : > { %1109 = vrot.lane.b32.xlu1 %v1648_v6, %s1859_s25 }
 0xefa   : > { %v1650_v8 = vpop.eup %1649 }
 0xefb   : > { %v1090_v9 = vadd.f32 1.0, %v1650_v8 }
 0xefd   : > { %1651 = vrcp.f32 %v1090_v9  ;;  %v1102_v15 = vand.u32 2147483648, %v1090_v9  ;;  %vm1096_vm6 = vweird.f32 %v1090_v9  ;;  %v1100_v16 = vand.u32 2147483647, %v1090_v9 }
 0xeff   : > { %v1103_v18 = vor.u32 1.1754944e-38, %v1102_v15  ;;  %vm1101_vm8 = vcmp.eq.f32.partialorder %v1100_v16, 8.507059e+37 }
 0xf03   : > { %v1652_v10 = vpop.eup %1651 }
 0xf04   : > { %v1092_v11 = vmul.f32 %v1652_v10, %v1090_v9  ;;  %vm1097_vm5 = vweird.f32 %v1652_v10 }
 0xf05   : > { %vm1098_vm7 = vmor %vm1096_vm6, %vm1097_vm5 }
 0xf06   : > { %v1093_v12 = vsub.f32 1.0, %v1092_v11 }
 0xf08   : > { %v1094_v13 = vmul.f32 %v1652_v10, %v1093_v12 }
 0xf0a   : > { %v1095_v14 = vadd.f32 %v1652_v10, %v1094_v13 }
 0xf0c   : > { %v1099_v17 = vsel %vm1098_vm7, %v1652_v10, %v1095_v14 }
 0xf0d   : > { %v1104_v20 = vsel %vm1101_vm8, %v1103_v18, %v1099_v17 }
 0xf0e   : > { %v1107_v22 = vmul.f32 %v1104_v20, %v1043_v62 }
 0xf6b   : > { %v1110_v19 = vpop.permute.xlu1 %1109 }
 0xf6c   : > { %v1112_v21 = vmul.f32 %v1110_v19, %v1104_v20 }
 0xf6e   : > { %1114 = vrot.lane.b32.xlu2 %v1112_v21, %s2334_s28 }
 0xfc8   : > { %v1115_v23 = vpop.permute.xlu2 %1114 }
 0xfc9   : > { %v1117_v24 = vadd.f32 %v1115_v23, %v1107_v22 }
 0xfcb   : > { %1653 = vtanh.f32 %v1117_v24 }
 0xfd1   : > { %v1654_v25 = vpop.eup %1653 }
 0xfd2   : > { %1120 = vrot.lane.b32.xlu0 %v1654_v25, %s1859_s25 }
0x1044   : > { %v1121_v26 = vpop.permute.xlu0 %1120 }
0x1045   : > { %v1123_v27 = vmul.f32 %v1121_v26, %v1104_v20 }
0x1047   : > { %1125 = vrot.lane.b32.xlu1 %v1123_v27, %s2334_s28 }
0x10b9   : > { %v1126_v28 = vpop.permute.xlu1 %1125 }
0x10ba   : > { %1129 = vst.msk [vmem:[%s1128_s14] sm:$0x3] %vm684_vm13, %v1126_v28  ;;  %1513 = vmatmul.msk.f32.vlgmr.msra.gmra.mxu1 %vm617_vm14, %v1126_v28  ;;  %s1250_s14 = sshll.u32 %s416_s15, 4  ;;  %s1251_s14 = int_to_ptr.vmem [resolvable:$true] %s1250_s14 }
0x1137   : > { %v1157_v30 = vpop.f32.mrf.mxu1 }
0x1138   : > { %v1160_v31 = vadd.f32 %v1157_v30, %v1133_v29 }
0x113a   : > { %1655 = vtanh.f32 %v1160_v31  ;;  %v1514_v33 = vmul.f32 -1.442695, %v1160_v31 }
0x113c   : > { %1657 = vpow2.f32 %v1514_v33 }
0x1140   : > { %v1656_v32 = vpop.eup %1655 }
0x1141   : > { %1183 = vrot.lane.b32.xlu2 %v1656_v32, %s1859_s25 }
0x1142   : > { %v1658_v34 = vpop.eup %1657 }
0x1143   : > { %v1164_v35 = vadd.f32 1.0, %v1658_v34 }
0x1145   : > { %1659 = vrcp.f32 %v1164_v35  ;;  %v1176_v41 = vand.u32 2147483648, %v1164_v35  ;;  %vm1170_vm9 = vweird.f32 %v1164_v35  ;;  %v1174_v42 = vand.u32 2147483647, %v1164_v35 }
0x1147   : > { %v1177_v44 = vor.u32 1.1754944e-38, %v1176_v41  ;;  %vm1175_vm11 = vcmp.eq.f32.partialorder %v1174_v42, 8.507059e+37 }
0x114b   : > { %v1660_v36 = vpop.eup %1659 }
0x114c   : > { %v1166_v37 = vmul.f32 %v1660_v36, %v1164_v35  ;;  %vm1171_vm14 = vweird.f32 %v1660_v36 }
0x114d   : > { %vm1172_vm10 = vmor %vm1170_vm9, %vm1171_vm14 }
0x114e   : > { %v1167_v38 = vsub.f32 1.0, %v1166_v37 }
0x1150   : > { %v1168_v39 = vmul.f32 %v1660_v36, %v1167_v38 }
0x1152   : > { %v1169_v40 = vadd.f32 %v1660_v36, %v1168_v39 }
0x1154   : > { %v1173_v43 = vsel %vm1172_vm10, %v1660_v36, %v1169_v40 }
0x1155   : > { %v1178_v46 = vsel %vm1175_vm11, %v1177_v44, %v1173_v43 }
0x1156   : > { %v1181_v48 = vmul.f32 %v1178_v46, %v1117_v24 }
0x119b   : > { %v1184_v45 = vpop.permute.xlu2 %1183 }
0x119c   : > { %v1186_v47 = vmul.f32 %v1184_v45, %v1178_v46 }
0x119e   : > { %1188 = vrot.lane.b32.xlu0 %v1186_v47, %s2334_s28 }
0x1210   : > { %v1189_v49 = vpop.permute.xlu0 %1188 }
0x1211   : > { %v1191_v50 = vadd.f32 %v1189_v49, %v1181_v48 }
0x1213   : > { %1661 = vtanh.f32 %v1191_v50  ;;  %1206 = vrot.lane.b32.xlu0 %v1191_v50, %s1861_s20 }
0x1219   : > { %v1662_v51 = vpop.eup %1661 }
0x121a   : > { %1194 = vrot.lane.b32.xlu1 %v1662_v51, %s1859_s25  ;;  %s1215_s25 = sand.u32 1, %s1934_s13  }
0x121b   : > { %s2250_s2 = scalar_lea.sflag [#allocation10], %s1215_s25 }
0x1285   : > { %v1207_v52 = vpop.permute.xlu0 %1206 }
0x1286   : > { %1209 = vst.msk [vmem:[%s423_s17] sm:$0x3] %vm684_vm13, %v1207_v52 }
0x128c   : > { %v1195_v53 = vpop.permute.xlu1 %1194 }
0x128d   : > { %v1197_v54 = vmul.f32 %v1195_v53, %v1178_v46 }
0x128f   : > { %1199 = vrot.lane.b32.xlu2 %v1197_v54, %s2334_s28  ;;  %s1262_s28 = scalar_lea.hbm %s2322_s9, %s1520_s26 }
0x1290   : > { %s1266_s23 = sshll.u32 %s1262_s28, 4  ;;  %s2248_s23 = int_to_ptr.hbm [resolvable:$true] %s1266_s23 }
0x12e9   : > { %v1200_v55 = vpop.permute.xlu2 %1199 }
0x12ea   : > { %1203 = vst.msk [vmem:[%s1202_s19] sm:$0x3] %vm684_vm13, %v1200_v55 }
0x12eb   : > { %1204 = vst.msk [vmem:[%s416_s15] sm:$0x3] %vm684_vm13, %v1200_v55 }
0x12ec   : > { %1750 = shalt.err (!%p1747_p10)
}
0x12ed   : > { %1532 = dma.vmem_to_hbm [thread:$0]  (%p1967_p11), %s1251_s14, 32, %s1253_s1, %s2250_s2  }
0x12ee   : > { %s1211_s26 = scalar_lea.sflag [#allocation5], %s2039_s4  ;;  %s1765_s11 = sshra.s32 %s2243_s22, 4  ;;  %s1766_s11 = int_to_ptr.hbm [resolvable:$true] %s1765_s11 }
0x12ef   : > { %s1767_s19 = scalar_lea.hbm %s1766_s11, 16  ;;  %s1771_s25 = scalar_lea.hbm %s2320_s7, 32 }
0x12f0   : > { %p1768_p2 = scmp.ne.s32.totalorder %s1766_s11, %s1767_s19  ;;  %p1772_p0 = scmp.lt.s32.totalorder %s1766_s11, %s2320_s7 }
0x12f1   : > { %p1773_p1 = scmp.lt.s32.totalorder %s1771_s25, %s1767_s19 }
0x12f2   : > { %p1769_p4 = pnand %p1768_p2, %p1967_p11 }
0x12f3   : > { %p1774_p7 = por %p1773_p1, %p1772_p0 }
0x12f4   : > { %p1770_p9 = pneg %p1769_p4 }
0x12f6   : > { %p1775_p8 = pnand %p1774_p7, %p1770_p9 }
0x12f8   : > { %1778 = shalt.err (!%p1775_p8)
}
0x12f9   : > { %s1862_s1 = smov 2   ;;  %s2370_s4 = smov 32  }
0x12fa   : > { %1531 = dma.vmem_to_hbm [thread:$0]  (%p1967_p11), %s2240_s5, 256, %s2243_s22, %s1211_s26, %s2370_s4, %s2370_s4, %s1862_s1  }
0x12fb   : > { %s1793_s14 = sshra.s32 %s2248_s23, 4  ;;  %s1799_s13 = scalar_lea.hbm %s2322_s9, 4  ;;  %s1794_s14 = int_to_ptr.hbm [resolvable:$true] %s1793_s14 }
0x12fc   : > { %s1795_s20 = scalar_lea.hbm %s1794_s14, 2  ;;  %p1800_p3 = scmp.lt.s32.totalorder %s1794_s14, %s2322_s9 }
0x12fd   : > { %p1796_p5 = scmp.ne.s32.totalorder %s1794_s14, %s1795_s20  ;;  %p1801_p10 = scmp.lt.s32.totalorder %s1799_s13, %s1795_s20 }
0x12ff   : > { %p1797_p6 = pnand %p1796_p5, %p1967_p11  ;;  %p1802_p2 = por %p1801_p10, %p1800_p3 }
0x1301   : > { %p1798_p13 = pneg %p1797_p6 }
0x1303   : > { %p1803_p4 = pnand %p1802_p2, %p1798_p13 }
0x1305   : > { %1806 = shalt.err (!%p1803_p4)
}
0x1306   : > { %1533 = dma.vmem_to_hbm [thread:$0]  (%p1967_p11), %s2246_s30, 32, %s2248_s23, %s2250_s2  }
0x1307 PF: > { %s2371_s5 = sld [smem:[#allocation16_spill]]  ;;  %p2373_p9 = scmp.ge.s32.totalorder %s1853_s12, 2 }
0x1309   : > { %p1545_p0 = pnand %p2373_p9, %p1971_p12 }
0x130b   : > { %p1546_p1 = pneg %p1545_p0 }
0x130d   : > { %s1278_s18 = sand.u32 1, %s2371_s5  }
0x130e   : > { %s1279_s17 = scalar_lea.sflag [#allocation5], %s1278_s18 }
0x130f   : > { %1832 = dma.done.wait (%p1546_p1), %s1279_s17, 256  }
0x1310   : > { %1834 = vsyncadd (%p1546_p1), %s1279_s17, 4294967040  ;;  %s2374_s26 = sadd.s32 4294967294, %s1853_s12  }
0x1311   : > { %s1288_s11 = sand.u32 1, %s2374_s26  }
0x1312   : > { %s1289_s21 = scalar_lea.sflag [#allocation10], %s1288_s11 }
0x1313   : > { %1836 = dma.done.wait (%p1546_p1), %s1289_s21, 64  }
0x1314   : > { %1838 = vsyncadd (%p1546_p1), %s1289_s21, 4294967232  ;;  %s2375_s12 = sld [smem:[#allocation18_spill]]  ;;  %s2378_s30 = smov %s1845_s10 }
0x1315   : > { %s2376_s23 = sld [smem:[#allocation17_spill]] }
0x1316   : > { %s2377_s11 = sld [smem:[#allocation19_spill]] }
0x131a   : > { %p29_p11 = scmp.ge.s32.totalorder %s2375_s12, 4  }
0x131b   : > { %s2379_s10 = smov %s2376_s23 }
0x131c   :  { %31 = sbr.rel (!%p29_p11) target bundleno = 16 (0x10), region = 164 }
0x1321   :  { %1305 = vsyncpa [#allocation4], 1 }
0x1322   :  { %1307 = vsyncpa [#allocation4 + $0x1], 1 }
0x1323   :  { %1308 = vsyncpa [#allocation7], 1 }
0x1324   :  { %1310 = vsyncpa [#allocation7 + $0x1], 1 }
0x1325   :  { %1311 = vsyncpa [#allocation5], 1 }
0x1326   :  { %1313 = vsyncpa [#allocation5 + $0x1], 1 }
0x1327   :  { %1314 = vsyncpa [#allocation10], 1 }
0x1328   :  { %1316 = vsyncpa [#allocation10 + $0x1], 1 }

</bundles_post_ra>
